<compile_context>
chip_gen: v7x
topology: tpu7x:2x2x1
jax: 0.10.0
libtpu: 0.0.40
codegen_flags: <defaults>
</compile_context>

<pallas_src>
import functools

import numpy as np
import jax
import jax.numpy as jnp
from jax import lax
from jax.experimental import pallas as pl
from jax.experimental.pallas import tpu as pltpu

channel_list = [128, 128, 128, 128, 64, 32, 16]

_NEG_SLOPE = 0.2
_PN_EPS = 1e-8
_VMEM_LIMIT = 32 * 1024 * 1024


def _ws_scale(cin, ksize, gain=2.0):
    return float((gain / (cin * ksize * ksize)) ** 0.5)


def _pixelnorm_lanes(h, eps=_PN_EPS):
    # channel axis is the last (lane) axis inside the kernels
    return h * lax.rsqrt(jnp.mean(h * h, axis=-1, keepdims=True) + eps)


def _lrelu(h, neg_slope=_NEG_SLOPE):
    return jnp.where(h >= 0, h, neg_slope * h)


def _grouped_conv3x3(tap_fn, w_ref):
    """3x3 conv as 3 MXU matmuls (K = 3*Cin each, grouped by ky).

    tap_fn(dy, dx) -> (M, Cin) bf16 tap.
    w_ref: (3, 3*Cin, Cout) bf16, group dy rows ordered (kx, cin), WS scale pre-folded.
    Returns the (M, Cout) f32 accumulator.
    """
    acc = None
    for dy in range(3):
        patches = jnp.concatenate([tap_fn(dy, dx) for dx in range(3)], axis=-1)
        part = jnp.dot(patches, w_ref[dy], preferred_element_type=jnp.float32)
        acc = part if acc is None else acc + part
    return acc


# --------------------------------------------------------------------------
# Kernel 1: init block  (PixelNorm -> ConvT 4x4 -> LReLU -> WSConv3x3 -> LReLU -> PN)
#           batched over TB latents per grid step.
# --------------------------------------------------------------------------
def _init_kernel(x_ref, wt_ref, bt_ref, w1_ref, b1_ref, o_ref, pad_ref, *, neg_slope, eps):
    TB, C0 = x_ref.shape
    x = _pixelnorm_lanes(x_ref[...].astype(jnp.float32), eps)            # PixelNorm(latent)

    # ConvTranspose2d(k=4,s=1,p=0) on a 1x1 input == one (TB,C0)x(C0,16*C0) matmul.
    y = jnp.dot(x.astype(wt_ref.dtype), wt_ref[...],
                preferred_element_type=jnp.float32)                      # (TB, 16*C0)
    y = _lrelu(y + bt_ref[...], neg_slope)                               # vectorized bias+LReLU

    # Place the 16 spatial positions in a zero-padded (6, 6, TB, C0) scratch whose
    # sublane axis is TB (multiple of 8): all stores / tap slices are tile-aligned.
    pad_ref[...] = jnp.zeros(pad_ref.shape, pad_ref.dtype)
    for p in range(16):
        ky, kx = p // 4, p % 4
        val = y[:, p * C0:(p + 1) * C0].astype(pad_ref.dtype)            # lane-aligned slice
        pad_ref[1 + ky:2 + ky, 1 + kx:2 + kx, :, :] = val.reshape(1, 1, TB, C0)

    def tap(dy, dx):
        return pad_ref[dy:dy + 4, dx:dx + 4, :, :].reshape(16 * TB, C0)

    acc = _grouped_conv3x3(tap, w1_ref) + b1_ref[...]                    # WSConv3x3
    h = _pixelnorm_lanes(_lrelu(acc, neg_slope), eps)                    # (16*TB, C0) f32
    o_ref[...] = h.reshape(16, TB, C0).astype(o_ref.dtype)               # bf16, (pos, sample)


def generator_init_block(x_nc, wt, bt, w1, b1, *, neg_slope=_NEG_SLOPE, eps=_PN_EPS, tb=8):
    """x_nc: (N, C0) latent.  wt: ConvTranspose2d weight (Cin, Cout, 4, 4);
    w1: WSConv weight (C0, C0, 3, 3) OIHW.  Returns (N, 4, 4, C0) bf16 NHWC."""
    N, C0 = x_nc.shape
    ng = pl.cdiv(N, tb)
    n_pad = ng * tb
    x_pad = jnp.zeros((n_pad, C0), jnp.float32).at[:N].set(x_nc.astype(jnp.float32))

    # (in, out, kh, kw) -> (in, kh, kw, out) -> (C0, 16*C0); columns ordered (p, out)
    wt_r = jnp.transpose(wt, (0, 2, 3, 1)).reshape(C0, 16 * C0).astype(jnp.bfloat16)
    bt_r = jnp.tile(bt.astype(jnp.float32), 16).reshape(1, 16 * C0)
    s1 = _ws_scale(C0, 3)
    w1_r = (jnp.transpose(w1, (2, 3, 1, 0)) * s1).reshape(3, 3 * C0, C0).astype(jnp.bfloat16)
    b1_r = b1.reshape(1, C0).astype(jnp.float32)

    kernel = functools.partial(_init_kernel, neg_slope=neg_slope, eps=eps)
    out = pl.pallas_call(
        kernel,
        out_shape=jax.ShapeDtypeStruct((ng, 16, tb, C0), jnp.bfloat16),
        grid_spec=pltpu.PrefetchScalarGridSpec(
            num_scalar_prefetch=0,
            grid=(ng,),
            in_specs=[
                pl.BlockSpec((tb, C0), lambda g: (g, 0)),
                pl.BlockSpec((C0, 16 * C0), lambda g: (0, 0)),
                pl.BlockSpec((1, 16 * C0), lambda g: (0, 0)),
                pl.BlockSpec((3, 3 * C0, C0), lambda g: (0, 0, 0)),
                pl.BlockSpec((1, C0), lambda g: (0, 0)),
            ],
            out_specs=pl.BlockSpec((None, 16, tb, C0), lambda g: (g, 0, 0, 0)),
            scratch_shapes=[pltpu.VMEM((6, 6, tb, C0), jnp.bfloat16)],
        ),
        compiler_params=pltpu.CompilerParams(
            dimension_semantics=("parallel",), vmem_limit_bytes=_VMEM_LIMIT),
    )(x_pad, wt_r, bt_r, w1_r, b1_r)
    # (ng, 16, tb, C0) -> (N, 4, 4, C0)   (tiny host-side layout fixup)
    out = jnp.transpose(out, (0, 2, 1, 3)).reshape(n_pad, 4, 4, C0)[:N]
    return out


# --------------------------------------------------------------------------
# Kernel 2/3: progressive block (in-kernel H-upsample + halo, two WSConv3x3).
#             Final block additionally fuses both toRGB 1x1 convs + fade_in.
# --------------------------------------------------------------------------
def _double_conv3x3(xw_ref, w1_ref, b1_ref, w2_ref, b2_ref, pad1_ref, pad2_ref,
                    neg_slope, eps):
    H, Wp, Cin = xw_ref.shape            # input rows, W already doubled + 1-px halo
    Ho, Wo = 2 * H, Wp - 2
    Cmid = w1_ref.shape[-1]
    M = Ho * Wo

    # nearest x2 along H: leading-dim broadcast + reshape (layout-free), aligned store.
    xw = xw_ref[...]                                                     # (H, Wp, Cin) bf16
    xup = jnp.broadcast_to(xw[:, None], (H, 2, Wp, Cin)).reshape(Ho, Wp, Cin)
    pad1_ref[0:1, :, :] = jnp.zeros((1, Wp, Cin), pad1_ref.dtype)        # top halo row
    pad1_ref[Ho + 1:Ho + 2, :, :] = jnp.zeros((1, Wp, Cin), pad1_ref.dtype)
    pad1_ref[1:Ho + 1, :, :] = xup                                       # W halo comes zeroed

    def tap1(dy, dx):
        return pad1_ref[dy:dy + Ho, dx:dx + Wo, :].reshape(M, Cin)

    acc1 = _grouped_conv3x3(tap1, w1_ref) + b1_ref[...]
    h1 = _pixelnorm_lanes(_lrelu(acc1, neg_slope), eps)                  # (M, Cmid) f32

    # conv-2 halo: re-zero only the 1-px border every step (required under "parallel")
    pad2_ref[0:1, :, :] = jnp.zeros((1, Wo + 2, Cmid), pad2_ref.dtype)
    pad2_ref[Ho + 1:Ho + 2, :, :] = jnp.zeros((1, Wo + 2, Cmid), pad2_ref.dtype)
    pad2_ref[:, 0:1, :] = jnp.zeros((Ho + 2, 1, Cmid), pad2_ref.dtype)
    pad2_ref[:, Wo + 1:Wo + 2, :] = jnp.zeros((Ho + 2, 1, Cmid), pad2_ref.dtype)
    pad2_ref[1:Ho + 1, 1:Wo + 1, :] = h1.reshape(Ho, Wo, Cmid).astype(pad2_ref.dtype)

    def tap2(dy, dx):
        return pad2_ref[dy:dy + Ho, dx:dx + Wo, :].reshape(M, Cmid)

    acc2 = _grouped_conv3x3(tap2, w2_ref) + b2_ref[...]
    h2 = _pixelnorm_lanes(_lrelu(acc2, neg_slope), eps)                  # (M, Cout) f32
    return h2


def _block_kernel(xw_ref, w1_ref, b1_ref, w2_ref, b2_ref, o_ref, pad1_ref, pad2_ref,
                  *, neg_slope, eps):
    h2 = _double_conv3x3(xw_ref, w1_ref, b1_ref, w2_ref, b2_ref,
                         pad1_ref, pad2_ref, neg_slope, eps)
    Ho, Wo, Cout = o_ref.shape
    o_ref[...] = h2.reshape(Ho, Wo, Cout).astype(o_ref.dtype)            # bf16


def _final_block_kernel(xw_ref, w1_ref, b1_ref, w2_ref, b2_ref,
                        wc_ref, wp_ref, brgb_ref, o_ref, pad1_ref, pad2_ref,
                        *, neg_slope, eps):
    h2 = _double_conv3x3(xw_ref, w1_ref, b1_ref, w2_ref, b2_ref,
                         pad1_ref, pad2_ref, neg_slope, eps)
    H, Wp, Cin = xw_ref.shape
    Ho, Wo = 2 * H, Wp - 2
    # fused fade_in(alpha, toRGB_prev(scaled), toRGB_cur(h2)); alpha/scales pre-folded.
    scaled = pad1_ref[1:Ho + 1, 1:Wo + 1, :].reshape(Ho * Wo, Cin)       # == upsampled input
    y = jnp.dot(h2.astype(wc_ref.dtype), wc_ref[...], preferred_element_type=jnp.float32)
    y = y + jnp.dot(scaled, wp_ref[...], preferred_element_type=jnp.float32)
    o_ref[...] = y + brgb_ref[...]                                       # (Ho*Wo, 3) f32


def _prep_block_input(x_nhwc):
    # host-side: double W (nearest) + 1-px W halo, in bf16 (the kernel doubles H).
    xw = jnp.repeat(x_nhwc.astype(jnp.bfloat16), 2, axis=2)
    return jnp.pad(xw, ((0, 0), (0, 0), (1, 1), (0, 0)))                 # (N, H, 2W+2, C)


def _prep_conv_weights(w1, b1, w2, b2):
    Cmid, Cin = w1.shape[0], w1.shape[1]
    Cout = w2.shape[0]
    s1, s2 = _ws_scale(Cin, 3), _ws_scale(Cmid, 3)
    # OIHW -> (ky, kx, cin, cout), fold WS scale, group rows by ky
    w1_r = (jnp.transpose(w1, (2, 3, 1, 0)) * s1).reshape(3, 3 * Cin, Cmid).astype(jnp.bfloat16)
    w2_r = (jnp.transpose(w2, (2, 3, 1, 0)) * s2).reshape(3, 3 * Cmid, Cout).astype(jnp.bfloat16)
    b1_r = b1.reshape(1, Cmid).astype(jnp.float32)
    b2_r = b2.reshape(1, Cout).astype(jnp.float32)
    return w1_r, b1_r, w2_r, b2_r


def generator_conv_block(x_nhwc, w1, b1, w2, b2, *, neg_slope=_NEG_SLOPE, eps=_PN_EPS):
    """x_nhwc: (N, H, W, Cin) block input (NOT yet upsampled); weights OIHW.
    Returns the block output (N, 2H, 2W, Cout) bf16 NHWC."""
    N, H, W, Cin = x_nhwc.shape
    Cmid, Cout = w1.shape[0], w2.shape[0]
    Ho, Wo, Wp = 2 * H, 2 * W, 2 * W + 2
    xw = _prep_block_input(x_nhwc)
    w1_r, b1_r, w2_r, b2_r = _prep_conv_weights(w1, b1, w2, b2)

    # TODO(synk): for resolutions >= 64x64 (v7x 64 MiB VMEM) add row-band spatial tiling
    # with a 1-row halo, and a sublane-dense layout for the Cout<=32 late blocks.
    kernel = functools.partial(_block_kernel, neg_slope=neg_slope, eps=eps)
    out = pl.pallas_call(
        kernel,
        out_shape=jax.ShapeDtypeStruct((N, Ho, Wo, Cout), jnp.bfloat16),
        grid_spec=pltpu.PrefetchScalarGridSpec(
            num_scalar_prefetch=0,
            grid=(N,),
            in_specs=[
                pl.BlockSpec((None, H, Wp, Cin), lambda n: (n, 0, 0, 0)),
                pl.BlockSpec((3, 3 * Cin, Cmid), lambda n: (0, 0, 0)),
                pl.BlockSpec((1, Cmid), lambda n: (0, 0)),
                pl.BlockSpec((3, 3 * Cmid, Cout), lambda n: (0, 0, 0)),
                pl.BlockSpec((1, Cout), lambda n: (0, 0)),
            ],
            out_specs=pl.BlockSpec((None, Ho, Wo, Cout), lambda n: (n, 0, 0, 0)),
            scratch_shapes=[pltpu.VMEM((Ho + 2, Wp, Cin), jnp.bfloat16),
                            pltpu.VMEM((Ho + 2, Wo + 2, Cmid), jnp.bfloat16)],
        ),
        compiler_params=pltpu.CompilerParams(
            dimension_semantics=("parallel",), vmem_limit_bytes=_VMEM_LIMIT),
    )(xw, w1_r, b1_r, w2_r, b2_r)
    return out


def generator_final_block(x_nhwc, w1, b1, w2, b2, w_cur, b_cur, w_prev, b_prev, alpha,
                          *, neg_slope=_NEG_SLOPE, eps=_PN_EPS):
    """Last progressive block fused with both toRGB 1x1 convs + fade_in.
    Returns (N, 2H, 2W, 3) f32."""
    N, H, W, Cin = x_nhwc.shape
    Cmid, Cout = w1.shape[0], w2.shape[0]
    Ho, Wo, Wp = 2 * H, 2 * W, 2 * W + 2
    xw = _prep_block_input(x_nhwc)
    w1_r, b1_r, w2_r, b2_r = _prep_conv_weights(w1, b1, w2, b2)

    alpha = float(alpha)
    sc, sp = _ws_scale(Cout, 1), _ws_scale(Cin, 1)
    wc = (jnp.transpose(w_cur.reshape(3, Cout)) * (sc * alpha)).astype(jnp.bfloat16)
    wp = (jnp.transpose(w_prev.reshape(3, Cin)) * (sp * (1.0 - alpha))).astype(jnp.bfloat16)
    bb = (alpha * b_cur + (1.0 - alpha) * b_prev).reshape(1, 3).astype(jnp.float32)

    kernel = functools.partial(_final_block_kernel, neg_slope=neg_slope, eps=eps)
    out = pl.pallas_call(
        kernel,
        out_shape=jax.ShapeDtypeStruct((N, Ho * Wo, 3), jnp.float32),
        grid_spec=pltpu.PrefetchScalarGridSpec(
            num_scalar_prefetch=0,
            grid=(N,),
            in_specs=[
                pl.BlockSpec((None, H, Wp, Cin), lambda n: (n, 0, 0, 0)),
                pl.BlockSpec((3, 3 * Cin, Cmid), lambda n: (0, 0, 0)),
                pl.BlockSpec((1, Cmid), lambda n: (0, 0)),
                pl.BlockSpec((3, 3 * Cmid, Cout), lambda n: (0, 0, 0)),
                pl.BlockSpec((1, Cout), lambda n: (0, 0)),
                pl.BlockSpec((Cout, 3), lambda n: (0, 0)),
                pl.BlockSpec((Cin, 3), lambda n: (0, 0)),
                pl.BlockSpec((1, 3), lambda n: (0, 0)),
            ],
            out_specs=pl.BlockSpec((None, Ho * Wo, 3), lambda n: (n, 0, 0)),
            scratch_shapes=[pltpu.VMEM((Ho + 2, Wp, Cin), jnp.bfloat16),
                            pltpu.VMEM((Ho + 2, Wo + 2, Cmid), jnp.bfloat16)],
        ),
        compiler_params=pltpu.CompilerParams(
            dimension_semantics=("parallel",), vmem_limit_bytes=_VMEM_LIMIT),
    )(xw, w1_r, b1_r, w2_r, b2_r, wc, wp, bb)
    return out.reshape(N, Ho, Wo, 3)


# --------------------------------------------------------------------------
# Kernel 4: standalone toRGB + fade (only needed for the steps == 0 path).
# --------------------------------------------------------------------------
def _torgb_fade_kernel(feat_ref, prev_ref, wc_ref, wp_ref, b_ref, o_ref):
    y = jnp.dot(feat_ref[...], wc_ref[...], preferred_element_type=jnp.float32)
    y = y + jnp.dot(prev_ref[...], wp_ref[...], preferred_element_type=jnp.float32)
    o_ref[...] = y + b_ref[...]


def torgb_fade(feat_nhwc, prev_nhwc, w_cur, b_cur, w_prev, b_prev, alpha):
    N, H, W, Cc = feat_nhwc.shape
    Cp = prev_nhwc.shape[-1]
    sc, sp = _ws_scale(Cc, 1), _ws_scale(Cp, 1)
    alpha = float(alpha)
    wc = (jnp.transpose(w_cur.reshape(3, Cc)) * (sc * alpha)).astype(jnp.bfloat16)
    wp = (jnp.transpose(w_prev.reshape(3, Cp)) * (sp * (1.0 - alpha))).astype(jnp.bfloat16)
    bb = (alpha * b_cur + (1.0 - alpha) * b_prev).reshape(1, 3).astype(jnp.float32)
    feat = feat_nhwc.reshape(N, H * W, Cc).astype(jnp.bfloat16)
    prev = prev_nhwc.reshape(N, H * W, Cp).astype(jnp.bfloat16)

    out = pl.pallas_call(
        _torgb_fade_kernel,
        out_shape=jax.ShapeDtypeStruct((N, H * W, 3), jnp.float32),
        grid_spec=pltpu.PrefetchScalarGridSpec(
            num_scalar_prefetch=0,
            grid=(N,),
            in_specs=[
                pl.BlockSpec((None, H * W, Cc), lambda n: (n, 0, 0)),
                pl.BlockSpec((None, H * W, Cp), lambda n: (n, 0, 0)),
                pl.BlockSpec((Cc, 3), lambda n: (0, 0)),
                pl.BlockSpec((Cp, 3), lambda n: (0, 0)),
                pl.BlockSpec((1, 3), lambda n: (0, 0)),
            ],
            out_specs=pl.BlockSpec((None, H * W, 3), lambda n: (n, 0, 0)),
        ),
        compiler_params=pltpu.CompilerParams(dimension_semantics=("parallel",)),
    )(feat, prev, wc, wp, bb)
    return out.reshape(N, H, W, 3)


# --------------------------------------------------------------------------
# Full Generator forward
# --------------------------------------------------------------------------
def generator_forward(x_nchw, alpha, params, steps):
    N, C0, Hin, Win = x_nchw.shape
    assert (Hin, Win) == (1, 1)
    out = generator_init_block(x_nchw.reshape(N, C0),
                               params['init_wt'], params['init_bt'],
                               params['init_w1'], params['init_b1'])       # (N,4,4,C0) bf16
    if steps == 0:
        rgb = torgb_fade(out, out, params['torgb_w'][0], params['torgb_b'][0],
                         params['torgb_w'][0], params['torgb_b'][0], 1.0)
        return jnp.transpose(rgb, (0, 3, 1, 2))

    rgb = None
    for step in range(1, steps + 1):
        w1, b1, w2, b2 = params['blocks'][step - 1]
        if step < steps:
            out = generator_conv_block(out, w1, b1, w2, b2)
        else:
            rgb = generator_final_block(out, w1, b1, w2, b2,
                                        params['torgb_w'][step], params['torgb_b'][step],
                                        params['torgb_w'][step - 1], params['torgb_b'][step - 1],
                                        alpha)
    return jnp.transpose(rgb, (0, 3, 1, 2))                                # NCHW (N,3,H,W)


# --------------------------------------------------------------------------
# Pure-JAX reference (f32, HIGHEST precision), mirroring the PyTorch module.
# --------------------------------------------------------------------------
def _reference(x_nchw, alpha, params, steps):
    def pn(h):
        return h / jnp.sqrt(jnp.mean(h * h, axis=1, keepdims=True) + _PN_EPS)

    def lrelu(h):
        return jnp.where(h >= 0, h, _NEG_SLOPE * h)

    def wsconv(h, w, b, k, pad):
        s = _ws_scale(w.shape[1], k)
        y = lax.conv_general_dilated(h * s, w, (1, 1), ((pad, pad), (pad, pad)),
                                     dimension_numbers=('NCHW', 'OIHW', 'NCHW'),
                                     precision=lax.Precision.HIGHEST)
        return y + b.reshape(1, -1, 1, 1)

    h = pn(x_nchw)
    h = jnp.einsum('nc,copq->nopq', h[:, :, 0, 0], params['init_wt'],
                   precision=lax.Precision.HIGHEST) + params['init_bt'].reshape(1, -1, 1, 1)
    h = lrelu(h)
    h = pn(lrelu(wsconv(h, params['init_w1'], params['init_b1'], 3, 1)))

    if steps == 0:
        return wsconv(h, params['torgb_w'][0], params['torgb_b'][0], 1, 0)

    scaled = None
    for step in range(1, steps + 1):
        w1, b1, w2, b2 = params['blocks'][step - 1]
        up = jnp.repeat(jnp.repeat(h, 2, axis=2), 2, axis=3)
        if step == steps:
            scaled = up
        h = pn(lrelu(wsconv(up, w1, b1, 3, 1)))
        h = pn(lrelu(wsconv(h, w2, b2, 3, 1)))

    upsampling = wsconv(scaled, params['torgb_w'][steps - 1], params['torgb_b'][steps - 1], 1, 0)
    generated = wsconv(h, params['torgb_w'][steps], params['torgb_b'][steps], 1, 0)
    return alpha * generated + (1.0 - alpha) * upsampling


if __name__ == "__main__":
    steps = 2                       # 1x1 -> 4x4 -> 8x8 -> 16x16
    N = 2
    alpha = 0.7
    C0 = channel_list[0]            # 128

    key = jax.random.PRNGKey(0)
    keys = jax.random.split(key, 16)
    x = jax.random.normal(keys[0], (N, C0, 1, 1), jnp.float32)

    params = {
        'init_wt': jax.random.normal(keys[1], (C0, C0, 4, 4), jnp.float32) * 0.05,
        'init_bt': jax.random.normal(keys[2], (C0,), jnp.float32) * 0.1,
        'init_w1': jax.random.normal(keys[3], (C0, C0, 3, 3), jnp.float32),
        'init_b1': jnp.zeros((C0,), jnp.float32),
        'blocks': [],
        'torgb_w': [],
        'torgb_b': [],
    }
    ki = 4
    for step in range(1, steps + 1):
        cin, cout = channel_list[step - 1], channel_list[step]
        w1 = jax.random.normal(keys[ki], (cout, cin, 3, 3), jnp.float32); ki += 1
        w2 = jax.random.normal(keys[ki], (cout, cout, 3, 3), jnp.float32); ki += 1
        params['blocks'].append((w1, jnp.zeros((cout,), jnp.float32),
                                 w2, jnp.zeros((cout,), jnp.float32)))
    for step in range(0, steps + 1):
        c = channel_list[step]
        params['torgb_w'].append(jax.random.normal(keys[ki], (3, c, 1, 1), jnp.float32)); ki += 1
        params['torgb_b'].append(jnp.zeros((3,), jnp.float32))

    out = jax.block_until_ready(generator_forward(x, alpha, params, steps))
    Hout = 4 * (2 ** steps)
    assert out.shape == (N, 3, Hout, Hout), out.shape

    ref = jax.block_until_ready(_reference(x, alpha, params, steps))
    np.testing.assert_allclose(np.asarray(out), np.asarray(ref), rtol=5e-2, atol=5e-2)
    print("KERNEL_OK")
</pallas_src>

<mosaic_0001>
module attributes {stable_mosaic.version = 11 : i64} {
  func.func @_init_kernel(%arg0: i32, %arg1: memref<8x128xf32, #tpu.memory_space<vmem>>, %arg2: memref<128x2048xbf16, #tpu.memory_space<vmem>>, %arg3: memref<1x2048xf32, #tpu.memory_space<vmem>>, %arg4: memref<3x384x128xbf16, #tpu.memory_space<vmem>>, %arg5: memref<1x128xf32, #tpu.memory_space<vmem>>, %arg6: memref<1x16x8x128xbf16, #tpu.memory_space<vmem>>, %arg7: memref<6x6x8x128xbf16, #tpu.memory_space<vmem>>) attributes {dimension_semantics = [#tpu.dimension_semantics<parallel>], iteration_bounds = array<i64: 1>, scalar_prefetch = 0 : i64, scratch_operands = 1 : i64, tpu.core_type = #tpu.core_type<tc>, window_params = [{transform_indices = @transform_0, window_bounds = array<i64: 8, 128>}, {pipeline_mode = #tpu.pipeline_mode<synchronous>, transform_indices = @transform_1, window_bounds = array<i64: 128, 2048>}, {pipeline_mode = #tpu.pipeline_mode<synchronous>, transform_indices = @transform_2, window_bounds = array<i64: 1, 2048>}, {pipeline_mode = #tpu.pipeline_mode<synchronous>, transform_indices = @transform_3, window_bounds = array<i64: 3, 384, 128>}, {pipeline_mode = #tpu.pipeline_mode<synchronous>, transform_indices = @transform_4, window_bounds = array<i64: 1, 128>}, {transform_indices = @transform_5, window_bounds = array<i64: 1, 16, 8, 128>}]} {
    %c0 = arith.constant 0 : index
    %c0_0 = arith.constant 0 : index
    %0 = vector.load %arg1[%c0, %c0_0] : memref<8x128xf32, #tpu.memory_space<vmem>>, vector<8x128xf32>
    %1 = arith.mulf %0, %0 : vector<8x128xf32>
    %cst = arith.constant dense<0.000000e+00> : vector<8xf32>
    %2 = vector.multi_reduction <add>, %1, %cst [1] : vector<8x128xf32> to vector<8xf32>
    %3 = vector.shape_cast %2 : vector<8xf32> to vector<8x1xf32>
    %cst_1 = arith.constant 1.280000e+02 : f32
    %4 = vector.broadcast %cst_1 : f32 to vector<8x1xf32>
    %5 = arith.divf %3, %4 : vector<8x1xf32>
    %cst_2 = arith.constant 9.99999993E-9 : f32
    %6 = vector.broadcast %cst_2 : f32 to vector<8x1xf32>
    %7 = arith.addf %5, %6 : vector<8x1xf32>
    %8 = math.rsqrt %7 : vector<8x1xf32>
    %9 = vector.broadcast %8 : vector<8x1xf32> to vector<8x128xf32>
    %10 = arith.mulf %0, %9 : vector<8x128xf32>
    %11 = arith.truncf %10 : vector<8x128xf32> to vector<8x128xbf16>
    %c0_3 = arith.constant 0 : index
    %c0_4 = arith.constant 0 : index
    %12 = vector.load %arg2[%c0_3, %c0_4] : memref<128x2048xbf16, #tpu.memory_space<vmem>>, vector<128x2048xbf16>
    %cst_5 = arith.constant dense<0.000000e+00> : vector<8x2048xf32>
    %13 = tpu.matmul %11, %12, %cst_5 {dimension_numbers = #tpu.dot_dimension_numbers<[1], [0], [0], [1], [0, 0, 1, 1], [], []>} : vector<8x128xbf16>, vector<128x2048xbf16>, vector<8x2048xf32> -> vector<8x2048xf32>
    %c0_6 = arith.constant 0 : index
    %c0_7 = arith.constant 0 : index
    %14 = vector.load %arg3[%c0_6, %c0_7] : memref<1x2048xf32, #tpu.memory_space<vmem>>, vector<1x2048xf32>
    %15 = vector.broadcast %14 : vector<1x2048xf32> to vector<8x2048xf32>
    %16 = arith.addf %13, %15 : vector<8x2048xf32>
    %cst_8 = arith.constant 0.000000e+00 : f32
    %17 = vector.broadcast %cst_8 : f32 to vector<8x2048xf32>
    %18 = arith.cmpf oge, %16, %17 : vector<8x2048xf32>
    %cst_9 = arith.constant 2.000000e-01 : f32
    %19 = vector.broadcast %cst_9 : f32 to vector<8x2048xf32>
    %20 = arith.mulf %19, %16 : vector<8x2048xf32>
    %21 = arith.select %18, %16, %20 : vector<8x2048xi1>, vector<8x2048xf32>
    %cst_10 = arith.constant 0.000000e+00 : bf16
    %22 = vector.broadcast %cst_10 : bf16 to vector<6x6x8x128xbf16>
    %c0_11 = arith.constant 0 : index
    %c0_12 = arith.constant 0 : index
    %c0_13 = arith.constant 0 : index
    %c0_14 = arith.constant 0 : index
    %23 = vector.load %arg7[%c0_11, %c0_12, %c0_13, %c0_14] : memref<6x6x8x128xbf16, #tpu.memory_space<vmem>>, vector<6x6x8x128xbf16>
    tpu.vector_store %arg7[%c0_11, %c0_12, %c0_13, %c0_14], %22 {strides = array<i32>} : memref<6x6x8x128xbf16, #tpu.memory_space<vmem>>, vector<6x6x8x128xbf16>,
    %24 = vector.extract_strided_slice %21 {offsets = [0, 0], sizes = [8, 128], strides = [1, 1]} : vector<8x2048xf32> to vector<8x128xf32>
    %25 = arith.truncf %24 : vector<8x128xf32> to vector<8x128xbf16>
    %26 = vector.shape_cast %25 : vector<8x128xbf16> to vector<1x1x8x128xbf16>
    %c1 = arith.constant 1 : index
    %c1_15 = arith.constant 1 : index
    %c0_16 = arith.constant 0 : index
    %c0_17 = arith.constant 0 : index
    %27 = vector.load %arg7[%c1, %c1_15, %c0_16, %c0_17] : memref<6x6x8x128xbf16, #tpu.memory_space<vmem>>, vector<1x1x8x128xbf16>
    tpu.vector_store %arg7[%c1, %c1_15, %c0_16, %c0_17], %26 {strides = array<i32>} : memref<6x6x8x128xbf16, #tpu.memory_space<vmem>>, vector<1x1x8x128xbf16>,
    %28 = vector.extract_strided_slice %21 {offsets = [0, 128], sizes = [8, 128], strides = [1, 1]} : vector<8x2048xf32> to vector<8x128xf32>
    %29 = arith.truncf %28 : vector<8x128xf32> to vector<8x128xbf16>
    %30 = vector.shape_cast %29 : vector<8x128xbf16> to vector<1x1x8x128xbf16>
    %c1_18 = arith.constant 1 : index
    %c2 = arith.constant 2 : index
    %c0_19 = arith.constant 0 : index
    %c0_20 = arith.constant 0 : index
    %31 = vector.load %arg7[%c1_18, %c2, %c0_19, %c0_20] : memref<6x6x8x128xbf16, #tpu.memory_space<vmem>>, vector<1x1x8x128xbf16>
    tpu.vector_store %arg7[%c1_18, %c2, %c0_19, %c0_20], %30 {strides = array<i32>} : memref<6x6x8x128xbf16, #tpu.memory_space<vmem>>, vector<1x1x8x128xbf16>,
    %32 = vector.extract_strided_slice %21 {offsets = [0, 256], sizes = [8, 128], strides = [1, 1]} : vector<8x2048xf32> to vector<8x128xf32>
    %33 = arith.truncf %32 : vector<8x128xf32> to vector<8x128xbf16>
    %34 = vector.shape_cast %33 : vector<8x128xbf16> to vector<1x1x8x128xbf16>
    %c1_21 = arith.constant 1 : index
    %c3 = arith.constant 3 : index
    %c0_22 = arith.constant 0 : index
    %c0_23 = arith.constant 0 : index
    %35 = vector.load %arg7[%c1_21, %c3, %c0_22, %c0_23] : memref<6x6x8x128xbf16, #tpu.memory_space<vmem>>, vector<1x1x8x128xbf16>
    tpu.vector_store %arg7[%c1_21, %c3, %c0_22, %c0_23], %34 {strides = array<i32>} : memref<6x6x8x128xbf16, #tpu.memory_space<vmem>>, vector<1x1x8x128xbf16>,
    %36 = vector.extract_strided_slice %21 {offsets = [0, 384], sizes = [8, 128], strides = [1, 1]} : vector<8x2048xf32> to vector<8x128xf32>
    %37 = arith.truncf %36 : vector<8x128xf32> to vector<8x128xbf16>
    %38 = vector.shape_cast %37 : vector<8x128xbf16> to vector<1x1x8x128xbf16>
    %c1_24 = arith.constant 1 : index
    %c4 = arith.constant 4 : index
    %c0_25 = arith.constant 0 : index
    %c0_26 = arith.constant 0 : index
    %39 = vector.load %arg7[%c1_24, %c4, %c0_25, %c0_26] : memref<6x6x8x128xbf16, #tpu.memory_space<vmem>>, vector<1x1x8x128xbf16>
    tpu.vector_store %arg7[%c1_24, %c4, %c0_25, %c0_26], %38 {strides = array<i32>} : memref<6x6x8x128xbf16, #tpu.memory_space<vmem>>, vector<1x1x8x128xbf16>,
    %40 = vector.extract_strided_slice %21 {offsets = [0, 512], sizes = [8, 128], strides = [1, 1]} : vector<8x2048xf32> to vector<8x128xf32>
    %41 = arith.truncf %40 : vector<8x128xf32> to vector<8x128xbf16>
    %42 = vector.shape_cast %41 : vector<8x128xbf16> to vector<1x1x8x128xbf16>
    %c2_27 = arith.constant 2 : index
    %c1_28 = arith.constant 1 : index
    %c0_29 = arith.constant 0 : index
    %c0_30 = arith.constant 0 : index
    %43 = vector.load %arg7[%c2_27, %c1_28, %c0_29, %c0_30] : memref<6x6x8x128xbf16, #tpu.memory_space<vmem>>, vector<1x1x8x128xbf16>
    tpu.vector_store %arg7[%c2_27, %c1_28, %c0_29, %c0_30], %42 {strides = array<i32>} : memref<6x6x8x128xbf16, #tpu.memory_space<vmem>>, vector<1x1x8x128xbf16>,
    %44 = vector.extract_strided_slice %21 {offsets = [0, 640], sizes = [8, 128], strides = [1, 1]} : vector<8x2048xf32> to vector<8x128xf32>
    %45 = arith.truncf %44 : vector<8x128xf32> to vector<8x128xbf16>
    %46 = vector.shape_cast %45 : vector<8x128xbf16> to vector<1x1x8x128xbf16>
    %c2_31 = arith.constant 2 : index
    %c2_32 = arith.constant 2 : index
    %c0_33 = arith.constant 0 : index
    %c0_34 = arith.constant 0 : index
    %47 = vector.load %arg7[%c2_31, %c2_32, %c0_33, %c0_34] : memref<6x6x8x128xbf16, #tpu.memory_space<vmem>>, vector<1x1x8x128xbf16>
    tpu.vector_store %arg7[%c2_31, %c2_32, %c0_33, %c0_34], %46 {strides = array<i32>} : memref<6x6x8x128xbf16, #tpu.memory_space<vmem>>, vector<1x1x8x128xbf16>,
    %48 = vector.extract_strided_slice %21 {offsets = [0, 768], sizes = [8, 128], strides = [1, 1]} : vector<8x2048xf32> to vector<8x128xf32>
    %49 = arith.truncf %48 : vector<8x128xf32> to vector<8x128xbf16>
    %50 = vector.shape_cast %49 : vector<8x128xbf16> to vector<1x1x8x128xbf16>
    %c2_35 = arith.constant 2 : index
    %c3_36 = arith.constant 3 : index
    %c0_37 = arith.constant 0 : index
    %c0_38 = arith.constant 0 : index
    %51 = vector.load %arg7[%c2_35, %c3_36, %c0_37, %c0_38] : memref<6x6x8x128xbf16, #tpu.memory_space<vmem>>, vector<1x1x8x128xbf16>
    tpu.vector_store %arg7[%c2_35, %c3_36, %c0_37, %c0_38], %50 {strides = array<i32>} : memref<6x6x8x128xbf16, #tpu.memory_space<vmem>>, vector<1x1x8x128xbf16>,
    %52 = vector.extract_strided_slice %21 {offsets = [0, 896], sizes = [8, 128], strides = [1, 1]} : vector<8x2048xf32> to vector<8x128xf32>
    %53 = arith.truncf %52 : vector<8x128xf32> to vector<8x128xbf16>
    %54 = vector.shape_cast %53 : vector<8x128xbf16> to vector<1x1x8x128xbf16>
    %c2_39 = arith.constant 2 : index
    %c4_40 = arith.constant 4 : index
    %c0_41 = arith.constant 0 : index
    %c0_42 = arith.constant 0 : index
    %55 = vector.load %arg7[%c2_39, %c4_40, %c0_41, %c0_42] : memref<6x6x8x128xbf16, #tpu.memory_space<vmem>>, vector<1x1x8x128xbf16>
    tpu.vector_store %arg7[%c2_39, %c4_40, %c0_41, %c0_42], %54 {strides = array<i32>} : memref<6x6x8x128xbf16, #tpu.memory_space<vmem>>, vector<1x1x8x128xbf16>,
    %56 = vector.extract_strided_slice %21 {offsets = [0, 1024], sizes = [8, 128], strides = [1, 1]} : vector<8x2048xf32> to vector<8x128xf32>
    %57 = arith.truncf %56 : vector<8x128xf32> to vector<8x128xbf16>
    %58 = vector.shape_cast %57 : vector<8x128xbf16> to vector<1x1x8x128xbf16>
    %c3_43 = arith.constant 3 : index
    %c1_44 = arith.constant 1 : index
    %c0_45 = arith.constant 0 : index
    %c0_46 = arith.constant 0 : index
    %59 = vector.load %arg7[%c3_43, %c1_44, %c0_45, %c0_46] : memref<6x6x8x128xbf16, #tpu.memory_space<vmem>>, vector<1x1x8x128xbf16>
    tpu.vector_store %arg7[%c3_43, %c1_44, %c0_45, %c0_46], %58 {strides = array<i32>} : memref<6x6x8x128xbf16, #tpu.memory_space<vmem>>, vector<1x1x8x128xbf16>,
    %60 = vector.extract_strided_slice %21 {offsets = [0, 1152], sizes = [8, 128], strides = [1, 1]} : vector<8x2048xf32> to vector<8x128xf32>
    %61 = arith.truncf %60 : vector<8x128xf32> to vector<8x128xbf16>
    %62 = vector.shape_cast %61 : vector<8x128xbf16> to vector<1x1x8x128xbf16>
    %c3_47 = arith.constant 3 : index
    %c2_48 = arith.constant 2 : index
    %c0_49 = arith.constant 0 : index
    %c0_50 = arith.constant 0 : index
    %63 = vector.load %arg7[%c3_47, %c2_48, %c0_49, %c0_50] : memref<6x6x8x128xbf16, #tpu.memory_space<vmem>>, vector<1x1x8x128xbf16>
    tpu.vector_store %arg7[%c3_47, %c2_48, %c0_49, %c0_50], %62 {strides = array<i32>} : memref<6x6x8x128xbf16, #tpu.memory_space<vmem>>, vector<1x1x8x128xbf16>,
    %64 = vector.extract_strided_slice %21 {offsets = [0, 1280], sizes = [8, 128], strides = [1, 1]} : vector<8x2048xf32> to vector<8x128xf32>
    %65 = arith.truncf %64 : vector<8x128xf32> to vector<8x128xbf16>
    %66 = vector.shape_cast %65 : vector<8x128xbf16> to vector<1x1x8x128xbf16>
    %c3_51 = arith.constant 3 : index
    %c3_52 = arith.constant 3 : index
    %c0_53 = arith.constant 0 : index
    %c0_54 = arith.constant 0 : index
    %67 = vector.load %arg7[%c3_51, %c3_52, %c0_53, %c0_54] : memref<6x6x8x128xbf16, #tpu.memory_space<vmem>>, vector<1x1x8x128xbf16>
    tpu.vector_store %arg7[%c3_51, %c3_52, %c0_53, %c0_54], %66 {strides = array<i32>} : memref<6x6x8x128xbf16, #tpu.memory_space<vmem>>, vector<1x1x8x128xbf16>,
    %68 = vector.extract_strided_slice %21 {offsets = [0, 1408], sizes = [8, 128], strides = [1, 1]} : vector<8x2048xf32> to vector<8x128xf32>
    %69 = arith.truncf %68 : vector<8x128xf32> to vector<8x128xbf16>
    %70 = vector.shape_cast %69 : vector<8x128xbf16> to vector<1x1x8x128xbf16>
    %c3_55 = arith.constant 3 : index
    %c4_56 = arith.constant 4 : index
    %c0_57 = arith.constant 0 : index
    %c0_58 = arith.constant 0 : index
    %71 = vector.load %arg7[%c3_55, %c4_56, %c0_57, %c0_58] : memref<6x6x8x128xbf16, #tpu.memory_space<vmem>>, vector<1x1x8x128xbf16>
    tpu.vector_store %arg7[%c3_55, %c4_56, %c0_57, %c0_58], %70 {strides = array<i32>} : memref<6x6x8x128xbf16, #tpu.memory_space<vmem>>, vector<1x1x8x128xbf16>,
    %72 = vector.extract_strided_slice %21 {offsets = [0, 1536], sizes = [8, 128], strides = [1, 1]} : vector<8x2048xf32> to vector<8x128xf32>
    %73 = arith.truncf %72 : vector<8x128xf32> to vector<8x128xbf16>
    %74 = vector.shape_cast %73 : vector<8x128xbf16> to vector<1x1x8x128xbf16>
    %c4_59 = arith.constant 4 : index
    %c1_60 = arith.constant 1 : index
    %c0_61 = arith.constant 0 : index
    %c0_62 = arith.constant 0 : index
    %75 = vector.load %arg7[%c4_59, %c1_60, %c0_61, %c0_62] : memref<6x6x8x128xbf16, #tpu.memory_space<vmem>>, vector<1x1x8x128xbf16>
    tpu.vector_store %arg7[%c4_59, %c1_60, %c0_61, %c0_62], %74 {strides = array<i32>} : memref<6x6x8x128xbf16, #tpu.memory_space<vmem>>, vector<1x1x8x128xbf16>,
    %76 = vector.extract_strided_slice %21 {offsets = [0, 1664], sizes = [8, 128], strides = [1, 1]} : vector<8x2048xf32> to vector<8x128xf32>
    %77 = arith.truncf %76 : vector<8x128xf32> to vector<8x128xbf16>
    %78 = vector.shape_cast %77 : vector<8x128xbf16> to vector<1x1x8x128xbf16>
    %c4_63 = arith.constant 4 : index
    %c2_64 = arith.constant 2 : index
    %c0_65 = arith.constant 0 : index
    %c0_66 = arith.constant 0 : index
    %79 = vector.load %arg7[%c4_63, %c2_64, %c0_65, %c0_66] : memref<6x6x8x128xbf16, #tpu.memory_space<vmem>>, vector<1x1x8x128xbf16>
    tpu.vector_store %arg7[%c4_63, %c2_64, %c0_65, %c0_66], %78 {strides = array<i32>} : memref<6x6x8x128xbf16, #tpu.memory_space<vmem>>, vector<1x1x8x128xbf16>,
    %80 = vector.extract_strided_slice %21 {offsets = [0, 1792], sizes = [8, 128], strides = [1, 1]} : vector<8x2048xf32> to vector<8x128xf32>
    %81 = arith.truncf %80 : vector<8x128xf32> to vector<8x128xbf16>
    %82 = vector.shape_cast %81 : vector<8x128xbf16> to vector<1x1x8x128xbf16>
    %c4_67 = arith.constant 4 : index
    %c3_68 = arith.constant 3 : index
    %c0_69 = arith.constant 0 : index
    %c0_70 = arith.constant 0 : index
    %83 = vector.load %arg7[%c4_67, %c3_68, %c0_69, %c0_70] : memref<6x6x8x128xbf16, #tpu.memory_space<vmem>>, vector<1x1x8x128xbf16>
    tpu.vector_store %arg7[%c4_67, %c3_68, %c0_69, %c0_70], %82 {strides = array<i32>} : memref<6x6x8x128xbf16, #tpu.memory_space<vmem>>, vector<1x1x8x128xbf16>,
    %84 = vector.extract_strided_slice %21 {offsets = [0, 1920], sizes = [8, 128], strides = [1, 1]} : vector<8x2048xf32> to vector<8x128xf32>
    %85 = arith.truncf %84 : vector<8x128xf32> to vector<8x128xbf16>
    %86 = vector.shape_cast %85 : vector<8x128xbf16> to vector<1x1x8x128xbf16>
    %c4_71 = arith.constant 4 : index
    %c4_72 = arith.constant 4 : index
    %c0_73 = arith.constant 0 : index
    %c0_74 = arith.constant 0 : index
    %87 = vector.load %arg7[%c4_71, %c4_72, %c0_73, %c0_74] : memref<6x6x8x128xbf16, #tpu.memory_space<vmem>>, vector<1x1x8x128xbf16>
    tpu.vector_store %arg7[%c4_71, %c4_72, %c0_73, %c0_74], %86 {strides = array<i32>} : memref<6x6x8x128xbf16, #tpu.memory_space<vmem>>, vector<1x1x8x128xbf16>,
    %c0_75 = arith.constant 0 : index
    %c0_76 = arith.constant 0 : index
    %c0_77 = arith.constant 0 : index
    %c0_78 = arith.constant 0 : index
    %88 = vector.load %arg7[%c0_75, %c0_76, %c0_77, %c0_78] : memref<6x6x8x128xbf16, #tpu.memory_space<vmem>>, vector<4x4x8x128xbf16>
    %89 = vector.shape_cast %88 : vector<4x4x8x128xbf16> to vector<128x128xbf16>
    %c0_79 = arith.constant 0 : index
    %c1_80 = arith.constant 1 : index
    %c0_81 = arith.constant 0 : index
    %c0_82 = arith.constant 0 : index
    %90 = vector.load %arg7[%c0_79, %c1_80, %c0_81, %c0_82] : memref<6x6x8x128xbf16, #tpu.memory_space<vmem>>, vector<4x4x8x128xbf16>
    %91 = vector.shape_cast %90 : vector<4x4x8x128xbf16> to vector<128x128xbf16>
    %c0_83 = arith.constant 0 : index
    %c2_84 = arith.constant 2 : index
    %c0_85 = arith.constant 0 : index
    %c0_86 = arith.constant 0 : index
    %92 = vector.load %arg7[%c0_83, %c2_84, %c0_85, %c0_86] : memref<6x6x8x128xbf16, #tpu.memory_space<vmem>>, vector<4x4x8x128xbf16>
    %93 = vector.shape_cast %92 : vector<4x4x8x128xbf16> to vector<128x128xbf16>
    %94 = tpu.concatenate %89, %91, %93 in 1 : vector<128x128xbf16>, vector<128x128xbf16>, vector<128x128xbf16> -> vector<128x384xbf16>
    %c0_87 = arith.constant 0 : index
    %c0_88 = arith.constant 0 : index
    %c0_89 = arith.constant 0 : index
    %95 = vector.load %arg4[%c0_87, %c0_88, %c0_89] : memref<3x384x128xbf16, #tpu.memory_space<vmem>>, vector<1x384x128xbf16>
    %96 = vector.shape_cast %95 : vector<1x384x128xbf16> to vector<384x128xbf16>
    %cst_90 = arith.constant dense<0.000000e+00> : vector<128x128xf32>
    %97 = tpu.matmul %94, %96, %cst_90 {dimension_numbers = #tpu.dot_dimension_numbers<[1], [0], [0], [1], [0, 0, 1, 1], [], []>} : vector<128x384xbf16>, vector<384x128xbf16>, vector<128x128xf32> -> vector<128x128xf32>
    %c1_91 = arith.constant 1 : index
    %c0_92 = arith.constant 0 : index
    %c0_93 = arith.constant 0 : index
    %c0_94 = arith.constant 0 : index
    %98 = vector.load %arg7[%c1_91, %c0_92, %c0_93, %c0_94] : memref<6x6x8x128xbf16, #tpu.memory_space<vmem>>, vector<4x4x8x128xbf16>
    %99 = vector.shape_cast %98 : vector<4x4x8x128xbf16> to vector<128x128xbf16>
    %c1_95 = arith.constant 1 : index
    %c1_96 = arith.constant 1 : index
    %c0_97 = arith.constant 0 : index
    %c0_98 = arith.constant 0 : index
    %100 = vector.load %arg7[%c1_95, %c1_96, %c0_97, %c0_98] : memref<6x6x8x128xbf16, #tpu.memory_space<vmem>>, vector<4x4x8x128xbf16>
    %101 = vector.shape_cast %100 : vector<4x4x8x128xbf16> to vector<128x128xbf16>
    %c1_99 = arith.constant 1 : index
    %c2_100 = arith.constant 2 : index
    %c0_101 = arith.constant 0 : index
    %c0_102 = arith.constant 0 : index
    %102 = vector.load %arg7[%c1_99, %c2_100, %c0_101, %c0_102] : memref<6x6x8x128xbf16, #tpu.memory_space<vmem>>, vector<4x4x8x128xbf16>
    %103 = vector.shape_cast %102 : vector<4x4x8x128xbf16> to vector<128x128xbf16>
    %104 = tpu.concatenate %99, %101, %103 in 1 : vector<128x128xbf16>, vector<128x128xbf16>, vector<128x128xbf16> -> vector<128x384xbf16>
    %c1_103 = arith.constant 1 : index
    %c0_104 = arith.constant 0 : index
    %c0_105 = arith.constant 0 : index
    %105 = vector.load %arg4[%c1_103, %c0_104, %c0_105] : memref<3x384x128xbf16, #tpu.memory_space<vmem>>, vector<1x384x128xbf16>
    %106 = vector.shape_cast %105 : vector<1x384x128xbf16> to vector<384x128xbf16>
    %cst_106 = arith.constant dense<0.000000e+00> : vector<128x128xf32>
    %107 = tpu.matmul %104, %106, %cst_106 {dimension_numbers = #tpu.dot_dimension_numbers<[1], [0], [0], [1], [0, 0, 1, 1], [], []>} : vector<128x384xbf16>, vector<384x128xbf16>, vector<128x128xf32> -> vector<128x128xf32>
    %108 = arith.addf %97, %107 : vector<128x128xf32>
    %c2_107 = arith.constant 2 : index
    %c0_108 = arith.constant 0 : index
    %c0_109 = arith.constant 0 : index
    %c0_110 = arith.constant 0 : index
    %109 = vector.load %arg7[%c2_107, %c0_108, %c0_109, %c0_110] : memref<6x6x8x128xbf16, #tpu.memory_space<vmem>>, vector<4x4x8x128xbf16>
    %110 = vector.shape_cast %109 : vector<4x4x8x128xbf16> to vector<128x128xbf16>
    %c2_111 = arith.constant 2 : index
    %c1_112 = arith.constant 1 : index
    %c0_113 = arith.constant 0 : index
    %c0_114 = arith.constant 0 : index
    %111 = vector.load %arg7[%c2_111, %c1_112, %c0_113, %c0_114] : memref<6x6x8x128xbf16, #tpu.memory_space<vmem>>, vector<4x4x8x128xbf16>
    %112 = vector.shape_cast %111 : vector<4x4x8x128xbf16> to vector<128x128xbf16>
    %c2_115 = arith.constant 2 : index
    %c2_116 = arith.constant 2 : index
    %c0_117 = arith.constant 0 : index
    %c0_118 = arith.constant 0 : index
    %113 = vector.load %arg7[%c2_115, %c2_116, %c0_117, %c0_118] : memref<6x6x8x128xbf16, #tpu.memory_space<vmem>>, vector<4x4x8x128xbf16>
    %114 = vector.shape_cast %113 : vector<4x4x8x128xbf16> to vector<128x128xbf16>
    %115 = tpu.concatenate %110, %112, %114 in 1 : vector<128x128xbf16>, vector<128x128xbf16>, vector<128x128xbf16> -> vector<128x384xbf16>
    %c2_119 = arith.constant 2 : index
    %c0_120 = arith.constant 0 : index
    %c0_121 = arith.constant 0 : index
    %116 = vector.load %arg4[%c2_119, %c0_120, %c0_121] : memref<3x384x128xbf16, #tpu.memory_space<vmem>>, vector<1x384x128xbf16>
    %117 = vector.shape_cast %116 : vector<1x384x128xbf16> to vector<384x128xbf16>
    %cst_122 = arith.constant dense<0.000000e+00> : vector<128x128xf32>
    %118 = tpu.matmul %115, %117, %cst_122 {dimension_numbers = #tpu.dot_dimension_numbers<[1], [0], [0], [1], [0, 0, 1, 1], [], []>} : vector<128x384xbf16>, vector<384x128xbf16>, vector<128x128xf32> -> vector<128x128xf32>
    %119 = arith.addf %108, %118 : vector<128x128xf32>
    %c0_123 = arith.constant 0 : index
    %c0_124 = arith.constant 0 : index
    %120 = vector.load %arg5[%c0_123, %c0_124] : memref<1x128xf32, #tpu.memory_space<vmem>>, vector<1x128xf32>
    %121 = vector.broadcast %120 : vector<1x128xf32> to vector<128x128xf32>
    %122 = arith.addf %119, %121 : vector<128x128xf32>
    %cst_125 = arith.constant 0.000000e+00 : f32
    %123 = vector.broadcast %cst_125 : f32 to vector<128x128xf32>
    %124 = arith.cmpf oge, %122, %123 : vector<128x128xf32>
    %cst_126 = arith.constant 2.000000e-01 : f32
    %125 = vector.broadcast %cst_126 : f32 to vector<128x128xf32>
    %126 = arith.mulf %125, %122 : vector<128x128xf32>
    %127 = arith.select %124, %122, %126 : vector<128x128xi1>, vector<128x128xf32>
    %128 = arith.mulf %127, %127 : vector<128x128xf32>
    %cst_127 = arith.constant dense<0.000000e+00> : vector<128xf32>
    %129 = vector.multi_reduction <add>, %128, %cst_127 [1] : vector<128x128xf32> to vector<128xf32>
    %130 = vector.shape_cast %129 : vector<128xf32> to vector<128x1xf32>
    %cst_128 = arith.constant 1.280000e+02 : f32
    %131 = vector.broadcast %cst_128 : f32 to vector<128x1xf32>
    %132 = arith.divf %130, %131 : vector<128x1xf32>
    %cst_129 = arith.constant 9.99999993E-9 : f32
    %133 = vector.broadcast %cst_129 : f32 to vector<128x1xf32>
    %134 = arith.addf %132, %133 : vector<128x1xf32>
    %135 = math.rsqrt %134 : vector<128x1xf32>
    %136 = vector.broadcast %135 : vector<128x1xf32> to vector<128x128xf32>
    %137 = arith.mulf %127, %136 : vector<128x128xf32>
    %138 = vector.shape_cast %137 : vector<128x128xf32> to vector<16x8x128xf32>
    %139 = arith.truncf %138 : vector<16x8x128xf32> to vector<16x8x128xbf16>
    %c0_130 = arith.constant 0 : index
    %c0_131 = arith.constant 0 : index
    %c0_132 = arith.constant 0 : index
    %c0_133 = arith.constant 0 : index
    %140 = vector.load %arg6[%c0_130, %c0_131, %c0_132, %c0_133] : memref<1x16x8x128xbf16, #tpu.memory_space<vmem>>, vector<1x16x8x128xbf16>
    %141 = vector.shape_cast %140 : vector<1x16x8x128xbf16> to vector<16x8x128xbf16>
    %142 = vector.shape_cast %139 : vector<16x8x128xbf16> to vector<1x16x8x128xbf16>
    tpu.vector_store %arg6[%c0_130, %c0_131, %c0_132, %c0_133], %142 {strides = array<i32>} : memref<1x16x8x128xbf16, #tpu.memory_space<vmem>>, vector<1x16x8x128xbf16>,
    return
  }
  func.func @transform_0(%arg0: i32) -> (i32, i32) {
    %c0_i32 = arith.constant 0 : i32
    %c0_i32_0 = arith.constant 0 : i32
    return %arg0, %c0_i32 : i32, i32
  }
  func.func @transform_1(%arg0: i32) -> (i32, i32) {
    %c0_i32 = arith.constant 0 : i32
    %c0_i32_0 = arith.constant 0 : i32
    %c0_i32_1 = arith.constant 0 : i32
    return %c0_i32, %c0_i32_0 : i32, i32
  }
  func.func @transform_2(%arg0: i32) -> (i32, i32) {
    %c0_i32 = arith.constant 0 : i32
    %c0_i32_0 = arith.constant 0 : i32
    %c0_i32_1 = arith.constant 0 : i32
    return %c0_i32, %c0_i32_0 : i32, i32
  }
  func.func @transform_3(%arg0: i32) -> (i32, i32, i32) {
    %c0_i32 = arith.constant 0 : i32
    %c0_i32_0 = arith.constant 0 : i32
    %c0_i32_1 = arith.constant 0 : i32
    %c0_i32_2 = arith.constant 0 : i32
    return %c0_i32, %c0_i32_0, %c0_i32_1 : i32, i32, i32
  }
  func.func @transform_4(%arg0: i32) -> (i32, i32) {
    %c0_i32 = arith.constant 0 : i32
    %c0_i32_0 = arith.constant 0 : i32
    %c0_i32_1 = arith.constant 0 : i32
    return %c0_i32, %c0_i32_0 : i32, i32
  }
  func.func @transform_5(%arg0: i32) -> (i32, i32, i32, i32) {
    %c0_i32 = arith.constant 0 : i32
    %c0_i32_0 = arith.constant 0 : i32
    %c0_i32_1 = arith.constant 0 : i32
    %c0_i32_2 = arith.constant 0 : i32
    return %arg0, %c0_i32, %c0_i32_0, %c0_i32_1 : i32, i32, i32, i32
  }
}

</mosaic_0001>

<bundles_post_ra>
// kernel: tpu_custom_call.1
= control target key start
LH: loop header
LB: loop body
LE: loop exit
PB: predicated region body
PF: predicated region fallthrough
CT: control target
= control target key end

     0   :  { %10 = vsyncpa [#allocation4], 0  ;;  %s4956_s0 = inlined_call_operand.hbm [shape: f32[8,128], index: 0, kind: input, shape index: {}]   ;;  %s4957_s1 = inlined_call_operand.hbm [shape: bf16[128,2048], index: 1, kind: input, shape index: {}]   ;;  %s4958_s2 = inlined_call_operand.hbm [shape: f32[1,2048], index: 2, kind: input, shape index: {}]   ;;  %s4959_s3 = inlined_call_operand.hbm [shape: bf16[3,384,128], index: 3, kind: input, shape index: {}]   ;;  %s4960_s4 = inlined_call_operand.vmem [shape: f32[1,128], index: 4, kind: input, shape index: {}]   ;;  %s4961_s5 = inlined_call_operand.hbm [shape: bf16[1,16,8,128], index: 5, kind: output, shape index: {}]  }
   0x1   :  { %11 = vsyncpa [#allocation7], 0 }
   0x2   :  { %12 = vsyncpa [#allocation10], 0 }
   0x3   :  { %13 = vsyncpa [#allocation5], 0  ;;  %s4462_s18 = smov [#allocation6]   ;;  %s4344_s22 = scalar_lea.hbm %s4957_s1, 16384 }
   0x4   :  { %s29_s19 = sshll.u32 %s4462_s18, 4  ;;  %p4345_p0 = scmp.ne.s32.totalorder %s4957_s1, %s4344_s22  ;;  %s30_s19 = int_to_ptr.vmem [resolvable:$true] %s29_s19 }
   0x5   :  { %p4348_p1 = scmp.lt.u32.totalorder %s4344_s22, %s4957_s1 }
   0x7   :  { %p4350_p2 = pnand %p4348_p1, %p4345_p0 }
   0x9   :  { %4353 = shalt.err (!%p4350_p2)
}
   0xa   :  { %s4354_s27 = scalar_lea.vmem %s30_s19, 16384  ;;  %p4359_p4 = scmp.lt.s32.totalorder %s30_s19, %s30_s19 }
   0xb   :  { %p4355_p3 = scmp.ne.s32.totalorder %s30_s19, %s4354_s27  ;;  %p4360_p5 = scmp.lt.s32.totalorder %s4354_s27, %s4354_s27 }
   0xd   :  { %p4361_p6 = por %p4360_p5, %p4359_p4 }
   0xf   :  { %p4362_p7 = pnand %p4361_p6, %p4355_p3 }
  0x11   :  { %4365 = shalt.err (!%p4362_p7)
}
  0x12   :  { %s4463_s28 = smov 1024   ;;  %s4464_s29 = smov 64  }
  0x13   :  { %35 = dma.hbm_to_vmem [thread:$0]  %s4957_s1, 16384, %s30_s19, [#allocation7], %s4463_s28, %s4463_s28, %s4464_s29  }
  0x14   :  { %s4465_s7 = smov [#allocation3]   ;;  %s4466_s9 = smov [#allocation8]  }
  0x15   :  { %s20_s8 = sshll.u32 %s4465_s7, 4  ;;  %s42_s10 = sshll.u32 %s4466_s9, 4  ;;  %s21_s8 = int_to_ptr.vmem [resolvable:$true] %s20_s8  ;;  %s43_s10 = int_to_ptr.vmem [resolvable:$true] %s42_s10 }
  0x16   :  { %s4366_s13 = scalar_lea.hbm %s4956_s0, 128 }
  0x17   :  { %p4367_p8 = scmp.ne.s32.totalorder %s4956_s0, %s4366_s13  ;;  %p4370_p9 = scmp.lt.u32.totalorder %s4366_s13, %s4956_s0 }
  0x19   :  { %p4372_p10 = pnand %p4370_p9, %p4367_p8 }
  0x1b   :  { %4375 = shalt.err (!%p4372_p10)
}
  0x1c   :  { %s4376_s1 = scalar_lea.vmem %s21_s8, 128  ;;  %p4381_p12 = scmp.lt.s32.totalorder %s21_s8, %s21_s8 }
  0x1d   :  { %p4377_p11 = scmp.ne.s32.totalorder %s21_s8, %s4376_s1  ;;  %p4382_p13 = scmp.lt.s32.totalorder %s4376_s1, %s4376_s1 }
  0x1f   :  { %p4383_p0 = por %p4382_p13, %p4381_p12 }
  0x21   :  { %p4384_p1 = pnand %p4383_p0, %p4377_p11 }
  0x23   :  { %4387 = shalt.err (!%p4384_p1)
}
  0x24   :  { %23 = dma.hbm_to_vmem [thread:$0]  %s4956_s0, 128, %s21_s8, [#allocation4]  }
  0x25   :  { %s4388_s22 = scalar_lea.hbm %s4958_s2, 256 }
  0x26   :  { %p4389_p2 = scmp.ne.s32.totalorder %s4958_s2, %s4388_s22  ;;  %p4392_p3 = scmp.lt.u32.totalorder %s4388_s22, %s4958_s2 }
  0x28   :  { %p4394_p4 = pnand %p4392_p3, %p4389_p2 }
  0x2a   :  { %4397 = shalt.err (!%p4394_p4)
}
  0x2b   :  { %s4398_s27 = scalar_lea.vmem %s43_s10, 256  ;;  %p4403_p6 = scmp.lt.s32.totalorder %s43_s10, %s43_s10 }
  0x2c   :  { %p4399_p5 = scmp.ne.s32.totalorder %s43_s10, %s4398_s27  ;;  %p4404_p7 = scmp.lt.s32.totalorder %s4398_s27, %s4398_s27 }
  0x2e   :  { %p4405_p8 = por %p4404_p7, %p4403_p6 }
  0x30   :  { %p4406_p9 = pnand %p4405_p8, %p4399_p5 }
  0x32   :  { %4409 = shalt.err (!%p4406_p9)
}
  0x33   :  { %45 = dma.hbm_to_vmem [thread:$0]  %s4958_s2, 256, %s43_s10, [#allocation7]  }
  0x34   :  { %s4467_s30 = smov [#allocation9]   ;;  %s4410_s9 = scalar_lea.hbm %s4959_s3, 9216 }
  0x35   :  { %s51_s6 = sshll.u32 %s4467_s30, 4  ;;  %p4411_p10 = scmp.ne.s32.totalorder %s4959_s3, %s4410_s9  ;;  %s52_s6 = int_to_ptr.vmem [resolvable:$true] %s51_s6 }
  0x36   :  { %p4414_p11 = scmp.lt.u32.totalorder %s4410_s9, %s4959_s3 }
  0x38   :  { %p4416_p12 = pnand %p4414_p11, %p4411_p10 }
  0x3a   :  { %4419 = shalt.err (!%p4416_p12)
}
  0x3b   :  { %s4420_s15 = scalar_lea.vmem %s52_s6, 9216  ;;  %p4425_p0 = scmp.lt.s32.totalorder %s52_s6, %s52_s6 }
  0x3c   :  { %p4421_p13 = scmp.ne.s32.totalorder %s52_s6, %s4420_s15  ;;  %p4426_p1 = scmp.lt.s32.totalorder %s4420_s15, %s4420_s15 }
  0x3e   :  { %p4427_p2 = por %p4426_p1, %p4425_p0 }
  0x40   :  { %p4428_p3 = pnand %p4427_p2, %p4421_p13 }
  0x42   :  { %4431 = shalt.err (!%p4428_p3)
}
  0x43   :  { %s4468_s2 = smov 4  }
  0x44   :  { %57 = dma.hbm_to_vmem [thread:$0]  %s4959_s3, 9216, %s52_s6, [#allocation10], %s4464_s29, %s4464_s29, %s4468_s2  }
  0x45   :  { %4454 = dma.done.wait [#allocation4], 128  }
  0x46   :  { %4455 = vsyncadd [#allocation4], 4294967168 }
  0x47   :  { %4456 = dma.done.wait [#allocation7], 16640  }
  0x48   :  { %4457 = vsyncadd [#allocation7], 4294950656 }
  0x49   :  { %4458 = dma.done.wait [#allocation10], 9216  }
  0x4a   :  { %4459 = vsyncadd [#allocation10], 4294958080  ;;  %v4553_v0 = vld [vmem:[#allocation3] sm:$0xff]  ;;  %v83_v1 = vld [vmem:[#allocation6] sm:$0xff] }
  0x4b   :  { %v91_v2 = vld [vmem:[#allocation6 + $0x40] sm:$0xff]  ;;  %v74_v3 = vmul.f32 %v4553_v0, %v4553_v0  ;;  %v84_v5 = vld [vmem:[#allocation6 + $0x8] sm:$0xff] }
  0x4c   :  { %v3386_v4 = vcombine.high %v83_v1, %v91_v2  ;;  %v92_v6 = vld [vmem:[#allocation6 + $0x48] sm:$0xff]  ;;  %v3385_v7 = vcombine.low %v83_v1, %v91_v2  ;;  %v99_v8 = vld [vmem:[#allocation6 + $0x80] sm:$0xff] }
  0x4d   :  { %v3388_v9 = vcombine.high %v84_v5, %v92_v6  ;;  %v3387_v10 = vcombine.low %v84_v5, %v92_v6  ;;  %v107_v11 = vld [vmem:[#allocation6 + $0xc0] sm:$0xff]  ;;  %v100_v12 = vld [vmem:[#allocation6 + $0x88] sm:$0xff]  ;;  %75 = vadd.xlane.f32.xlu0 %v74_v3  ;;  %v4557_v3 = vld [vmem:[#allocation6 + $0x10] sm:$0xff] }
  0x4e   :  { %v108_v13 = vld [vmem:[#allocation6 + $0xc8] sm:$0xff]  ;;  %935 = vmatprep.subr.bf16.mxu0 %v3386_v4  ;;  %v3402_v14 = vcombine.high %v99_v8, %v107_v11  ;;  %v115_v16 = vld [vmem:[#allocation6 + $0x100] sm:$0xff]  ;;  %v3401_v19 = vcombine.low %v99_v8, %v107_v11  ;;  %v4559_v4 = vld [vmem:[#allocation6 + $0x50] sm:$0xff]  ;;  %v4469_v11 = vmov 0  }
  0x4f   :  { %v3404_v15 = vcombine.high %v100_v12, %v108_v13  ;;  %v123_v17 = vld [vmem:[#allocation6 + $0x140] sm:$0xff]  ;;  %v116_v18 = vld [vmem:[#allocation6 + $0x108] sm:$0xff]  ;;  %976 = vmatprep.subr.bf16.mxu1 %v3388_v9  ;;  %936 = vmatpush1.bf16.msra.mxu0 %v3385_v7  ;;  %v3403_v23 = vcombine.low %v100_v12, %v108_v13  ;;  %v4561_v5 = vld [vmem:[#allocation6 + $0x18] sm:$0xff]  ;;  %v3390_v6 = vcombine.high %v4557_v3, %v4559_v4 }
  0x50   :  { %v124_v20 = vld [vmem:[#allocation6 + $0x148] sm:$0xff]  ;;  %v131_v21 = vld [vmem:[#allocation6 + $0x180] sm:$0xff]  ;;  %977 = vmatpush1.bf16.msra.mxu1 %v3387_v10  ;;  %937 = vmatprep.subr.bf16.mxu0 %v3402_v14  ;;  %v3418_v24 = vcombine.high %v115_v16, %v123_v17  ;;  %v3417_v28 = vcombine.low %v115_v16, %v123_v17  ;;  %v4565_v7 = vld [vmem:[#allocation6 + $0x58] sm:$0xff]  ;;  %v3389_v8 = vcombine.low %v4557_v3, %v4559_v4 }
  0x51   :  { %v139_v22 = vld [vmem:[#allocation6 + $0x1c0] sm:$0xff]  ;;  %v132_v25 = vld [vmem:[#allocation6 + $0x188] sm:$0xff]  ;;  %978 = vmatprep.subr.bf16.mxu1 %v3404_v15  ;;  %v3420_v27 = vcombine.high %v116_v18, %v124_v20  ;;  %v3419_v29 = vcombine.low %v116_v18, %v124_v20  ;;  %v3391_v9 = vcombine.low %v4561_v5, %v4565_v7  ;;  %v3392_v10 = vcombine.high %v4561_v5, %v4565_v7  ;;  %v101_v15 = vld [vmem:[#allocation6 + $0x90] sm:$0xff] }
  0x52   :  { %v140_v26 = vld [vmem:[#allocation6 + $0x1c8] sm:$0xff]  ;;  %v3434_v30 = vcombine.high %v131_v21, %v139_v22  ;;  %v3433_v32 = vcombine.low %v131_v21, %v139_v22  ;;  %v147_v34 = vld [vmem:[#allocation6 + $0x200] sm:$0xff]  ;;  %967 = vmatprep.mubr.bf16.mxu0 %v4469_v11  ;;  %1311 = vst [vmem:[#allocation2] sm:$0xf] %v4469_v11  ;;  %1312 = vst [vmem:[#allocation2 + $0x4] sm:$0xf] %v4469_v11  ;;  %1008 = vmatprep.mubr.bf16.mxu1 %v4469_v11 }
  0x53   :  { %938 = vmatpush1.bf16.msra.mxu0 %v3401_v19  ;;  %v3436_v31 = vcombine.high %v132_v25, %v140_v26  ;;  %v3435_v33 = vcombine.low %v132_v25, %v140_v26  ;;  %v155_v35 = vld [vmem:[#allocation6 + $0x240] sm:$0xff]  ;;  %v148_v36 = vld [vmem:[#allocation6 + $0x208] sm:$0xff]  ;;  %1313 = vst [vmem:[#allocation2 + $0x8] sm:$0xf] %v4469_v11  ;;  %1314 = vst [vmem:[#allocation2 + $0xc] sm:$0xf] %v4469_v11 }
  0x54   :  { %979 = vmatpush1.bf16.msra.mxu1 %v3403_v23  ;;  %939 = vmatprep.subr.bf16.mxu0 %v3418_v24  ;;  %v3450_v37 = vcombine.high %v147_v34, %v155_v35  ;;  %v156_v38 = vld [vmem:[#allocation6 + $0x248] sm:$0xff]  ;;  %v3449_v40 = vcombine.low %v147_v34, %v155_v35  ;;  %v163_v42 = vld [vmem:[#allocation6 + $0x280] sm:$0xff]  ;;  %1315 = vst [vmem:[#allocation2 + $0x10] sm:$0xf] %v4469_v11  ;;  %1316 = vst [vmem:[#allocation2 + $0x14] sm:$0xf] %v4469_v11 }
  0x55   :  { %980 = vmatprep.subr.bf16.mxu1 %v3420_v27  ;;  %v3452_v39 = vcombine.high %v148_v36, %v156_v38  ;;  %v3451_v41 = vcombine.low %v148_v36, %v156_v38  ;;  %v171_v43 = vld [vmem:[#allocation6 + $0x2c0] sm:$0xff]  ;;  %v164_v44 = vld [vmem:[#allocation6 + $0x288] sm:$0xff]  ;;  %1317 = vst [vmem:[#allocation2 + $0x18] sm:$0xf] %v4469_v11  ;;  %1318 = vst [vmem:[#allocation2 + $0x1c] sm:$0xf] %v4469_v11 }
  0x56   :  { %v3466_v45 = vcombine.high %v163_v42, %v171_v43  ;;  %v172_v46 = vld [vmem:[#allocation6 + $0x2c8] sm:$0xff]  ;;  %v3465_v48 = vcombine.low %v163_v42, %v171_v43  ;;  %v179_v50 = vld [vmem:[#allocation6 + $0x300] sm:$0xff]  ;;  %1319 = vst [vmem:[#allocation2 + $0x20] sm:$0xf] %v4469_v11  ;;  %1320 = vst [vmem:[#allocation2 + $0x24] sm:$0xf] %v4469_v11 }
  0x57   :  { %940 = vmatpush1.bf16.msra.mxu0 %v3417_v28  ;;  %v3468_v47 = vcombine.high %v164_v44, %v172_v46  ;;  %v3467_v49 = vcombine.low %v164_v44, %v172_v46  ;;  %v187_v51 = vld [vmem:[#allocation6 + $0x340] sm:$0xff]  ;;  %v180_v52 = vld [vmem:[#allocation6 + $0x308] sm:$0xff]  ;;  %1321 = vst [vmem:[#allocation2 + $0x28] sm:$0xf] %v4469_v11  ;;  %1322 = vst [vmem:[#allocation2 + $0x2c] sm:$0xf] %v4469_v11 }
  0x58   :  { %981 = vmatpush1.bf16.msra.mxu1 %v3419_v29  ;;  %941 = vmatprep.subr.bf16.mxu0 %v3434_v30  ;;  %v3482_v53 = vcombine.high %v179_v50, %v187_v51  ;;  %v188_v54 = vld [vmem:[#allocation6 + $0x348] sm:$0xff]  ;;  %v3481_v56 = vcombine.low %v179_v50, %v187_v51  ;;  %v195_v58 = vld [vmem:[#allocation6 + $0x380] sm:$0xff]  ;;  %1323 = vst [vmem:[#allocation2 + $0x30] sm:$0xf] %v4469_v11  ;;  %1324 = vst [vmem:[#allocation2 + $0x34] sm:$0xf] %v4469_v11 }
  0x59   :  { %982 = vmatprep.subr.bf16.mxu1 %v3436_v31  ;;  %v3484_v55 = vcombine.high %v180_v52, %v188_v54  ;;  %v3483_v57 = vcombine.low %v180_v52, %v188_v54  ;;  %v203_v59 = vld [vmem:[#allocation6 + $0x3c0] sm:$0xff]  ;;  %v196_v60 = vld [vmem:[#allocation6 + $0x388] sm:$0xff]  ;;  %1325 = vst [vmem:[#allocation2 + $0x38] sm:$0xf] %v4469_v11  ;;  %1326 = vst [vmem:[#allocation2 + $0x3c] sm:$0xf] %v4469_v11 }
  0x5a   :  { %v3498_v61 = vcombine.high %v195_v58, %v203_v59  ;;  %v204_v62 = vld [vmem:[#allocation6 + $0x3c8] sm:$0xff]  ;;  %v3497_v1 = vcombine.low %v195_v58, %v203_v59  ;;  %1327 = vst [vmem:[#allocation2 + $0x40] sm:$0xf] %v4469_v11  ;;  %1328 = vst [vmem:[#allocation2 + $0x44] sm:$0xf] %v4469_v11  ;;  %v109_v17 = vld [vmem:[#allocation6 + $0xd0] sm:$0xff] }
  0x5b   :  { %942 = vmatpush1.bf16.msra.mxu0 %v3433_v32  ;;  %v3500_v63 = vcombine.high %v196_v60, %v204_v62  ;;  %v3499_v2 = vcombine.low %v196_v60, %v204_v62  ;;  %1329 = vst [vmem:[#allocation2 + $0x48] sm:$0xf] %v4469_v11  ;;  %1330 = vst [vmem:[#allocation2 + $0x4c] sm:$0xf] %v4469_v11  ;;  %v102_v18 = vld [vmem:[#allocation6 + $0x98] sm:$0xff]  ;;  %v3406_v22 = vcombine.high %v101_v15, %v109_v17  ;;  %v117_v24 = vld [vmem:[#allocation6 + $0x110] sm:$0xff] }
  0x5c   :  { %983 = vmatpush1.bf16.msra.mxu1 %v3435_v33  ;;  %943 = vmatprep.subr.bf16.mxu0 %v3450_v37  ;;  %1331 = vst [vmem:[#allocation2 + $0x50] sm:$0xf] %v4469_v11  ;;  %1332 = vst [vmem:[#allocation2 + $0x54] sm:$0xf] %v4469_v11  ;;  %v110_v19 = vld [vmem:[#allocation6 + $0xd8] sm:$0xff]  ;;  %v125_v25 = vld [vmem:[#allocation6 + $0x150] sm:$0xff]  ;;  %v3405_v28 = vcombine.low %v101_v15, %v109_v17 }
  0x5d   :  { %984 = vmatprep.subr.bf16.mxu1 %v3452_v39  ;;  %1333 = vst [vmem:[#allocation2 + $0x58] sm:$0xf] %v4469_v11  ;;  %1334 = vst [vmem:[#allocation2 + $0x5c] sm:$0xf] %v4469_v11  ;;  %v3408_v23 = vcombine.high %v102_v18, %v110_v19  ;;  %v118_v26 = vld [vmem:[#allocation6 + $0x118] sm:$0xff]  ;;  %v3407_v29 = vcombine.low %v102_v18, %v110_v19  ;;  %v3422_v30 = vcombine.high %v117_v24, %v125_v25  ;;  %v133_v31 = vld [vmem:[#allocation6 + $0x190] sm:$0xff] }
  0x5e   :  { %1335 = vst [vmem:[#allocation2 + $0x60] sm:$0xf] %v4469_v11  ;;  %1336 = vst [vmem:[#allocation2 + $0x64] sm:$0xf] %v4469_v11  ;;  %v126_v27 = vld [vmem:[#allocation6 + $0x158] sm:$0xff]  ;;  %v141_v32 = vld [vmem:[#allocation6 + $0x1d0] sm:$0xff]  ;;  %v3421_v35 = vcombine.low %v117_v24, %v125_v25 }
  0x5f   :  { %944 = vmatpush1.bf16.msra.mxu0 %v3449_v40  ;;  %1337 = vst [vmem:[#allocation2 + $0x68] sm:$0xf] %v4469_v11  ;;  %1338 = vst [vmem:[#allocation2 + $0x6c] sm:$0xf] %v4469_v11  ;;  %v134_v33 = vld [vmem:[#allocation6 + $0x198] sm:$0xff]  ;;  %v3423_v36 = vcombine.low %v118_v26, %v126_v27  ;;  %v3438_v37 = vcombine.high %v133_v31, %v141_v32  ;;  %v149_v39 = vld [vmem:[#allocation6 + $0x210] sm:$0xff]  ;;  %v3437_v43 = vcombine.low %v133_v31, %v141_v32 }
  0x60   :  { %985 = vmatpush1.bf16.msra.mxu1 %v3451_v41  ;;  %945 = vmatprep.subr.bf16.mxu0 %v3466_v45  ;;  %1339 = vst [vmem:[#allocation2 + $0x70] sm:$0xf] %v4469_v11  ;;  %1340 = vst [vmem:[#allocation2 + $0x74] sm:$0xf] %v4469_v11  ;;  %v142_v34 = vld [vmem:[#allocation6 + $0x1d8] sm:$0xff]  ;;  %v157_v40 = vld [vmem:[#allocation6 + $0x250] sm:$0xff] }
  0x61   :  { %986 = vmatprep.subr.bf16.mxu1 %v3468_v47  ;;  %1341 = vst [vmem:[#allocation2 + $0x78] sm:$0xf] %v4469_v11  ;;  %1342 = vst [vmem:[#allocation2 + $0x7c] sm:$0xf] %v4469_v11  ;;  %v3440_v38 = vcombine.high %v134_v33, %v142_v34  ;;  %v150_v41 = vld [vmem:[#allocation6 + $0x218] sm:$0xff]  ;;  %v3439_v44 = vcombine.low %v134_v33, %v142_v34  ;;  %v3454_v45 = vcombine.high %v149_v39, %v157_v40  ;;  %v165_v47 = vld [vmem:[#allocation6 + $0x290] sm:$0xff] }
  0x62   :  { %1343 = vst [vmem:[#allocation2 + $0x80] sm:$0xf] %v4469_v11  ;;  %1344 = vst [vmem:[#allocation2 + $0x84] sm:$0xf] %v4469_v11  ;;  %v158_v42 = vld [vmem:[#allocation6 + $0x258] sm:$0xff]  ;;  %v3453_v51 = vcombine.low %v149_v39, %v157_v40  ;;  %v103_v17 = vld [vmem:[#allocation6 + $0xa0] sm:$0xff] }
  0x63   :  { %946 = vmatpush1.bf16.msra.mxu0 %v3465_v48  ;;  %1345 = vst [vmem:[#allocation2 + $0x88] sm:$0xf] %v4469_v11  ;;  %1346 = vst [vmem:[#allocation2 + $0x8c] sm:$0xf] %v4469_v11  ;;  %v3456_v46 = vcombine.high %v150_v41, %v158_v42  ;;  %v173_v48 = vld [vmem:[#allocation6 + $0x2d0] sm:$0xff]  ;;  %v174_v50 = vld [vmem:[#allocation6 + $0x2d8] sm:$0xff]  ;;  %v3455_v52 = vcombine.low %v150_v41, %v158_v42 }
  0x64   :  { %987 = vmatpush1.bf16.msra.mxu1 %v3467_v49  ;;  %947 = vmatprep.subr.bf16.mxu0 %v3482_v53  ;;  %v166_v49 = vld [vmem:[#allocation6 + $0x298] sm:$0xff]  ;;  %v3470_v53 = vcombine.high %v165_v47, %v173_v48  ;;  %v3469_v59 = vcombine.low %v165_v47, %v173_v48  ;;  %v111_v18 = vld [vmem:[#allocation6 + $0xe0] sm:$0xff]  ;;  %v104_v19 = vld [vmem:[#allocation6 + $0xa8] sm:$0xff] }
  0x65   :  { %988 = vmatprep.subr.bf16.mxu1 %v3484_v55  ;;  %v3472_v54 = vcombine.high %v166_v49, %v174_v50  ;;  %v181_v55 = vld [vmem:[#allocation6 + $0x310] sm:$0xff]  ;;  %v190_v58 = vld [vmem:[#allocation6 + $0x358] sm:$0xff]  ;;  %v3471_v60 = vcombine.low %v166_v49, %v174_v50  ;;  %v3410_v24 = vcombine.high %v103_v17, %v111_v18  ;;  %v135_v33 = vld [vmem:[#allocation6 + $0x1a0] sm:$0xff] }
  0x66   :  { %v206_v3 = vld [vmem:[#allocation6 + $0x3d8] sm:$0xff]  ;;  %v143_v34 = vld [vmem:[#allocation6 + $0x1e0] sm:$0xff] }
  0x67   :  { %948 = vmatpush1.bf16.msra.mxu0 %v3481_v56  ;;  %v189_v56 = vld [vmem:[#allocation6 + $0x350] sm:$0xff]  ;;  %v3442_v39 = vcombine.high %v135_v33, %v143_v34  ;;  %v151_v41 = vld [vmem:[#allocation6 + $0x220] sm:$0xff] }
  0x68   :  { %989 = vmatpush1.bf16.msra.mxu1 %v3483_v57  ;;  %949 = vmatprep.subr.bf16.mxu0 %v3498_v61  ;;  %v182_v57 = vld [vmem:[#allocation6 + $0x318] sm:$0xff]  ;;  %v3486_v61 = vcombine.high %v181_v55, %v189_v56  ;;  %v3485_v4 = vcombine.low %v181_v55, %v189_v56  ;;  %v159_v42 = vld [vmem:[#allocation6 + $0x260] sm:$0xff] }
  0x69   :  { %990 = vmatprep.subr.bf16.mxu1 %v3500_v63  ;;  %v3488_v62 = vcombine.high %v182_v57, %v190_v58  ;;  %v197_v63 = vld [vmem:[#allocation6 + $0x390] sm:$0xff]  ;;  %v3487_v5 = vcombine.low %v182_v57, %v190_v58  ;;  %v3458_v47 = vcombine.high %v151_v41, %v159_v42  ;;  %v167_v49 = vld [vmem:[#allocation6 + $0x2a0] sm:$0xff] }
  0x6a   :  { %v175_v50 = vld [vmem:[#allocation6 + $0x2e0] sm:$0xff] }
  0x6b   :  { %950 = vmatpush1.bf16.msra.mxu0 %v3497_v1  ;;  %v205_v1 = vld [vmem:[#allocation6 + $0x3d0] sm:$0xff]  ;;  %v3474_v55 = vcombine.high %v167_v49, %v175_v50  ;;  %v183_v57 = vld [vmem:[#allocation6 + $0x320] sm:$0xff] }
  0x6c   :  { %991 = vmatpush1.bf16.msra.mxu1 %v3499_v2  ;;  %1017 = vmatprep.subr.bf16.mxu0 %v3390_v6  ;;  %v198_v2 = vld [vmem:[#allocation6 + $0x398] sm:$0xff]  ;;  %v3502_v6 = vcombine.high %v197_v63, %v205_v1  ;;  %v191_v58 = vld [vmem:[#allocation6 + $0x360] sm:$0xff] }
  0x6d   :  { %1058 = vmatprep.subr.bf16.mxu1 %v3392_v10  ;;  %v3504_v7 = vcombine.high %v198_v2, %v206_v3  ;;  %v88_v10 = vld [vmem:[#allocation6 + $0x28] sm:$0xff] }
  0xda   :  { %v76_v12 = vpop.xlane.xlu0 %75 }
  0xdb   :  { %v78_v13 = vmul.f32 0.0078125, %v76_v12  ;;  %v96_v12 = vld [vmem:[#allocation6 + $0x68] sm:$0xff] }
  0xdd   :  { %v79_v14 = vadd.f32 1e-08, %v78_v13  ;;  %v3501_v13 = vcombine.low %v197_v63, %v205_v1  ;;  %v3490_v63 = vcombine.high %v183_v57, %v191_v58 }
  0xdf   :  { %4310 = vrsqrt.f32 %v79_v14  ;;  %v3503_v14 = vcombine.low %v198_v2, %v206_v3  ;;  %v199_v2 = vld [vmem:[#allocation6 + $0x3a0] sm:$0xff] }
  0xe0   :  { %v207_v3 = vld [vmem:[#allocation6 + $0x3e0] sm:$0xff] }
  0xe9   :  { %v4311_v16 = vpop.eup %4310 }
  0xea   :  { %v81_v20 = vmul.f32 %v4311_v16, %v4553_v0  ;;  %v3424_v0 = vcombine.high %v118_v26, %v126_v27  ;;  %v3396_v16 = vcombine.high %v88_v10, %v96_v12  ;;  %v119_v26 = vld [vmem:[#allocation6 + $0x120] sm:$0xff] }
  0xeb   :  { %v127_v27 = vld [vmem:[#allocation6 + $0x160] sm:$0xff] }
  0xec   :  { %v4612_v21 = vpack.c.bf16 %v81_v20, %v81_v20  ;;  %v112_v20 = vld [vmem:[#allocation6 + $0xe8] sm:$0xff]  ;;  %v3426_v31 = vcombine.high %v119_v26, %v127_v27 }
  0xed   :  { %v3412_v25 = vcombine.high %v104_v19, %v112_v20 }
  0xee   :  { %968 = vmatmul.mubr.bf16.vlgmr.msra.gmra.mrb[0].mxu0 %v4612_v21  ;;  %1009 = vmatmul.mubr.bf16.vlgmr.msra.gmra.mrb[0].mxu1 %v4612_v21 }
  0xef   :  { %1018 = vmatpush1.bf16.msra.mxu0 %v3389_v8  ;;  %1059 = vmatpush1.bf16.msra.mxu1 %v3391_v9  ;;  %v87_v8 = vld [vmem:[#allocation6 + $0x20] sm:$0xff] }
  0xf0   :  { %1019 = vmatprep.subr.bf16.mxu0 %v3406_v22  ;;  %1060 = vmatprep.subr.bf16.mxu1 %v3408_v23  ;;  %v95_v9 = vld [vmem:[#allocation6 + $0x60] sm:$0xff]  ;;  %v3395_v23 = vcombine.low %v88_v10, %v96_v12  ;;  %v89_v10 = vld [vmem:[#allocation6 + $0x30] sm:$0xff] }
  0xf1   :  { %1049 = vmatprep.mubr.bf16.mxu0 %v4469_v11  ;;  %1090 = vmatprep.mubr.bf16.mxu1 %v4469_v11  ;;  %v3394_v15 = vcombine.high %v87_v8, %v95_v9  ;;  %v3393_v22 = vcombine.low %v87_v8, %v95_v9  ;;  %v3506_v8 = vcombine.high %v199_v2, %v207_v3  ;;  %v97_v12 = vld [vmem:[#allocation6 + $0x70] sm:$0xff] }
  0xf3   :  { %1020 = vmatpush1.bf16.msra.mxu0 %v3405_v28  ;;  %1061 = vmatpush1.bf16.msra.mxu1 %v3407_v29  ;;  %v120_v28 = vld [vmem:[#allocation6 + $0x128] sm:$0xff] }
  0xf4   :  { %1021 = vmatprep.subr.bf16.mxu0 %v3422_v30  ;;  %1062 = vmatprep.subr.bf16.mxu1 %v3424_v0  ;;  %v128_v29 = vld [vmem:[#allocation6 + $0x168] sm:$0xff]  ;;  %v3409_v30 = vcombine.low %v103_v17, %v111_v18  ;;  %v3411_v0 = vcombine.low %v104_v19, %v112_v20  ;;  %v3398_v17 = vcombine.high %v89_v10, %v97_v12  ;;  %v105_v19 = vld [vmem:[#allocation6 + $0xb0] sm:$0xff] }
  0xf5   :  { %v3428_v32 = vcombine.high %v120_v28, %v128_v29  ;;  %v113_v20 = vld [vmem:[#allocation6 + $0xf0] sm:$0xff] }
  0xf7   :  { %1022 = vmatpush1.bf16.msra.mxu0 %v3421_v35  ;;  %1063 = vmatpush1.bf16.msra.mxu1 %v3423_v36  ;;  %v136_v35 = vld [vmem:[#allocation6 + $0x1a8] sm:$0xff] }
  0xf8   :  { %1023 = vmatprep.subr.bf16.mxu0 %v3438_v37  ;;  %1064 = vmatprep.subr.bf16.mxu1 %v3440_v38  ;;  %v144_v36 = vld [vmem:[#allocation6 + $0x1e8] sm:$0xff]  ;;  %v3425_v37 = vcombine.low %v119_v26, %v127_v27  ;;  %v3427_v38 = vcombine.low %v120_v28, %v128_v29  ;;  %v3414_v26 = vcombine.high %v105_v19, %v113_v20  ;;  %v121_v28 = vld [vmem:[#allocation6 + $0x130] sm:$0xff] }
  0xf9   :  { %v3444_v40 = vcombine.high %v136_v35, %v144_v36  ;;  %v129_v29 = vld [vmem:[#allocation6 + $0x170] sm:$0xff] }
  0xfb   :  { %1024 = vmatpush1.bf16.msra.mxu0 %v3437_v43  ;;  %1065 = vmatpush1.bf16.msra.mxu1 %v3439_v44  ;;  %v152_v43 = vld [vmem:[#allocation6 + $0x228] sm:$0xff] }
  0xfc   :  { %1025 = vmatprep.subr.bf16.mxu0 %v3454_v45  ;;  %1066 = vmatprep.subr.bf16.mxu1 %v3456_v46  ;;  %v160_v44 = vld [vmem:[#allocation6 + $0x268] sm:$0xff]  ;;  %v3441_v45 = vcombine.low %v135_v33, %v143_v34  ;;  %v3443_v46 = vcombine.low %v136_v35, %v144_v36  ;;  %v3430_v33 = vcombine.high %v121_v28, %v129_v29  ;;  %v137_v35 = vld [vmem:[#allocation6 + $0x1b0] sm:$0xff] }
  0xfd   :  { %v3460_v48 = vcombine.high %v152_v43, %v160_v44  ;;  %v145_v36 = vld [vmem:[#allocation6 + $0x1f0] sm:$0xff] }
  0xff   :  { %1026 = vmatpush1.bf16.msra.mxu0 %v3453_v51  ;;  %1067 = vmatpush1.bf16.msra.mxu1 %v3455_v52  ;;  %v168_v51 = vld [vmem:[#allocation6 + $0x2a8] sm:$0xff] }
 0x100   :  { %1027 = vmatprep.subr.bf16.mxu0 %v3470_v53  ;;  %1068 = vmatprep.subr.bf16.mxu1 %v3472_v54  ;;  %v176_v52 = vld [vmem:[#allocation6 + $0x2e8] sm:$0xff]  ;;  %v3457_v53 = vcombine.low %v151_v41, %v159_v42  ;;  %v3459_v54 = vcombine.low %v152_v43, %v160_v44  ;;  %v3446_v41 = vcombine.high %v137_v35, %v145_v36  ;;  %v153_v43 = vld [vmem:[#allocation6 + $0x230] sm:$0xff] }
 0x101   :  { %v3476_v56 = vcombine.high %v168_v51, %v176_v52  ;;  %v161_v44 = vld [vmem:[#allocation6 + $0x270] sm:$0xff] }
 0x103   :  { %1028 = vmatpush1.bf16.msra.mxu0 %v3469_v59  ;;  %1069 = vmatpush1.bf16.msra.mxu1 %v3471_v60  ;;  %v184_v59 = vld [vmem:[#allocation6 + $0x328] sm:$0xff] }
 0x104   :  { %1029 = vmatprep.subr.bf16.mxu0 %v3486_v61  ;;  %1070 = vmatprep.subr.bf16.mxu1 %v3488_v62  ;;  %v192_v60 = vld [vmem:[#allocation6 + $0x368] sm:$0xff]  ;;  %v3473_v61 = vcombine.low %v167_v49, %v175_v50  ;;  %v3475_v62 = vcombine.low %v168_v51, %v176_v52  ;;  %v3462_v49 = vcombine.high %v153_v43, %v161_v44  ;;  %v169_v50 = vld [vmem:[#allocation6 + $0x2b0] sm:$0xff]  ;;  %v170_v52 = vld [vmem:[#allocation6 + $0x2b8] sm:$0xff] }
 0x105   :  { %v3492_v1 = vcombine.high %v184_v59, %v192_v60  ;;  %v177_v51 = vld [vmem:[#allocation6 + $0x2f0] sm:$0xff] }
 0x107   :  { %1030 = vmatpush1.bf16.msra.mxu0 %v3485_v4  ;;  %1071 = vmatpush1.bf16.msra.mxu1 %v3487_v5  ;;  %v200_v4 = vld [vmem:[#allocation6 + $0x3a8] sm:$0xff] }
 0x108   :  { %1031 = vmatprep.subr.bf16.mxu0 %v3502_v6  ;;  %1072 = vmatprep.subr.bf16.mxu1 %v3504_v7  ;;  %v208_v5 = vld [vmem:[#allocation6 + $0x3e8] sm:$0xff]  ;;  %v3489_v6 = vcombine.low %v183_v57, %v191_v58  ;;  %v3491_v7 = vcombine.low %v184_v59, %v192_v60  ;;  %v185_v58 = vld [vmem:[#allocation6 + $0x330] sm:$0xff]  ;;  %v186_v60 = vld [vmem:[#allocation6 + $0x338] sm:$0xff] }
 0x109   :  { %v3508_v9 = vcombine.high %v200_v4, %v208_v5  ;;  %v193_v59 = vld [vmem:[#allocation6 + $0x370] sm:$0xff] }
 0x10b   :  { %1032 = vmatpush1.bf16.msra.mxu0 %v3501_v13  ;;  %1073 = vmatpush1.bf16.msra.mxu1 %v3503_v14  ;;  %v90_v13 = vld [vmem:[#allocation6 + $0x38] sm:$0xff] }
 0x10c   :  { %1099 = vmatprep.subr.bf16.mxu0 %v3394_v15  ;;  %1140 = vmatprep.subr.bf16.mxu1 %v3396_v16  ;;  %v98_v14 = vld [vmem:[#allocation6 + $0x78] sm:$0xff]  ;;  %v3505_v15 = vcombine.low %v199_v2, %v207_v3  ;;  %v3507_v16 = vcombine.low %v200_v4, %v208_v5  ;;  %v201_v3 = vld [vmem:[#allocation6 + $0x3b0] sm:$0xff] }
 0x10d   :  { %v3400_v18 = vcombine.high %v90_v13, %v98_v14  ;;  %v209_v4 = vld [vmem:[#allocation6 + $0x3f0] sm:$0xff]  ;;  %v202_v5 = vld [vmem:[#allocation6 + $0x3b8] sm:$0xff] }
 0x10e   :  { %1050 = vmatmul.mubr.bf16.vlgmr.msra.gmra.mrb[4].mxu0 %v4612_v21  ;;  %1091 = vmatmul.mubr.bf16.vlgmr.msra.gmra.mrb[4].mxu1 %v4612_v21 }
 0x10f   :  { %1100 = vmatpush1.bf16.msra.mxu0 %v3393_v22  ;;  %1141 = vmatpush1.bf16.msra.mxu1 %v3395_v23  ;;  %v106_v22 = vld [vmem:[#allocation6 + $0xb8] sm:$0xff] }
 0x110   :  { %1101 = vmatprep.subr.bf16.mxu0 %v3410_v24  ;;  %1142 = vmatprep.subr.bf16.mxu1 %v3412_v25  ;;  %v114_v23 = vld [vmem:[#allocation6 + $0xf8] sm:$0xff]  ;;  %v3397_v24 = vcombine.low %v89_v10, %v97_v12  ;;  %v3399_v25 = vcombine.low %v90_v13, %v98_v14  ;;  %v3509_v12 = vcombine.low %v201_v3, %v209_v4  ;;  %v4166_v14 = vld [vmem:[#allocation9 + $0x100] sm:$0xff]  }
 0x111   :  { %1131 = vmatprep.mubr.bf16.mxu0 %v4469_v11  ;;  %1172 = vmatprep.mubr.bf16.mxu1 %v4469_v11  ;;  %v3416_v27 = vcombine.high %v106_v22, %v114_v23 }
 0x113   :  { %1102 = vmatpush1.bf16.msra.mxu0 %v3409_v30  ;;  %1143 = vmatpush1.bf16.msra.mxu1 %v3411_v0  ;;  %v122_v30 = vld [vmem:[#allocation6 + $0x138] sm:$0xff] }
 0x114   :  { %1103 = vmatprep.subr.bf16.mxu0 %v3426_v31  ;;  %1144 = vmatprep.subr.bf16.mxu1 %v3428_v32  ;;  %v130_v0 = vld [vmem:[#allocation6 + $0x178] sm:$0xff]  ;;  %v3413_v31 = vcombine.low %v105_v19, %v113_v20  ;;  %v3415_v32 = vcombine.low %v106_v22, %v114_v23  ;;  %v4172_v20 = vld [vmem:[#allocation9 + $0x110] sm:$0xff]  }
 0x115   :  { %v3432_v34 = vcombine.high %v122_v30, %v130_v0  ;;  %v4171_v19 = vld [vmem:[#allocation9 + $0xc8] sm:$0xff]   ;;  %v4173_v22 = vld [vmem:[#allocation9 + $0x150] sm:$0xff]  }
 0x116   :  { %v4174_v23 = vld [vmem:[#allocation9 + $0xd0] sm:$0xff]  }
 0x117   :  { %1104 = vmatpush1.bf16.msra.mxu0 %v3425_v37  ;;  %1145 = vmatpush1.bf16.msra.mxu1 %v3427_v38  ;;  %v138_v37 = vld [vmem:[#allocation6 + $0x1b8] sm:$0xff] }
 0x118   :  { %1105 = vmatprep.subr.bf16.mxu0 %v3442_v39  ;;  %1146 = vmatprep.subr.bf16.mxu1 %v3444_v40  ;;  %v146_v38 = vld [vmem:[#allocation6 + $0x1f8] sm:$0xff]  ;;  %v3429_v39 = vcombine.low %v121_v28, %v129_v29  ;;  %v3431_v40 = vcombine.low %v122_v30, %v130_v0  ;;  %v4180_v28 = vld [vmem:[#allocation9 + $0xe0] sm:$0xff]  }
 0x119   :  { %v3448_v42 = vcombine.high %v138_v37, %v146_v38  ;;  %v4181_v29 = vld [vmem:[#allocation9 + $0x128] sm:$0xff]  }
 0x11a   :  { %v4182_v30 = vld [vmem:[#allocation9 + $0x168] sm:$0xff]  }
 0x11b   :  { %1106 = vmatpush1.bf16.msra.mxu0 %v3441_v45  ;;  %1147 = vmatpush1.bf16.msra.mxu1 %v3443_v46  ;;  %v154_v45 = vld [vmem:[#allocation6 + $0x238] sm:$0xff] }
 0x11c   :  { %1107 = vmatprep.subr.bf16.mxu0 %v3458_v47  ;;  %1148 = vmatprep.subr.bf16.mxu1 %v3460_v48  ;;  %v162_v46 = vld [vmem:[#allocation6 + $0x278] sm:$0xff]  ;;  %v3445_v47 = vcombine.low %v137_v35, %v145_v36  ;;  %v3447_v48 = vcombine.low %v138_v37, %v146_v38  ;;  %v4188_v35 = vld [vmem:[#allocation9 + $0x178] sm:$0xff]   ;;  %v4202_v37 = vld [vmem:[#allocation9 + $0x1c0] sm:$0xff]  }
 0x11d   :  { %v4183_v0 = vld [vmem:[#allocation9 + $0xe8] sm:$0xff]   ;;  %v4189_v36 = vld [vmem:[#allocation9 + $0xf8] sm:$0xff]   ;;  %v4211_v38 = vld [vmem:[#allocation9 + $0x40] sm:$0xff]  }
 0x11f   :  { %1108 = vmatpush1.bf16.msra.mxu0 %v3457_v53  ;;  %1149 = vmatpush1.bf16.msra.mxu1 %v3459_v54  ;;  %v178_v53 = vld [vmem:[#allocation6 + $0x2f8] sm:$0xff]  ;;  %v3461_v54 = vcombine.low %v153_v43, %v161_v44  ;;  %v4632_v43 = vld [vmem:[#allocation8] sm:$0xff] }
 0x120   :  { %1109 = vmatprep.subr.bf16.mxu0 %v3474_v55  ;;  %1150 = vmatprep.subr.bf16.mxu1 %v3476_v56  ;;  %v3463_v55 = vcombine.low %v154_v45, %v162_v46  ;;  %v3478_v56 = vcombine.high %v169_v50, %v177_v51  ;;  %v3480_v57 = vcombine.high %v170_v52, %v178_v53 }
 0x123   :  { %1110 = vmatpush1.bf16.msra.mxu0 %v3473_v61  ;;  %1151 = vmatpush1.bf16.msra.mxu1 %v3475_v62  ;;  %v194_v61 = vld [vmem:[#allocation6 + $0x378] sm:$0xff]  ;;  %v3477_v62 = vcombine.low %v169_v50, %v177_v51 }
 0x124   :  { %1111 = vmatprep.subr.bf16.mxu0 %v3490_v63  ;;  %1152 = vmatprep.subr.bf16.mxu1 %v3492_v1  ;;  %v3479_v63 = vcombine.low %v170_v52, %v178_v53  ;;  %v3494_v1 = vcombine.high %v185_v58, %v193_v59  ;;  %v3496_v2 = vcombine.high %v186_v60, %v194_v61 }
 0x127   :  { %1112 = vmatpush1.bf16.msra.mxu0 %v3489_v6  ;;  %1153 = vmatpush1.bf16.msra.mxu1 %v3491_v7  ;;  %v210_v6 = vld [vmem:[#allocation6 + $0x3f8] sm:$0xff]  ;;  %v3493_v7 = vcombine.low %v185_v58, %v193_v59 }
 0x128   :  { %1113 = vmatprep.subr.bf16.mxu0 %v3506_v8  ;;  %1154 = vmatprep.subr.bf16.mxu1 %v3508_v9  ;;  %v3495_v8 = vcombine.low %v186_v60, %v194_v61  ;;  %v3510_v9 = vcombine.high %v201_v3, %v209_v4  ;;  %v3512_v10 = vcombine.high %v202_v5, %v210_v6 }
 0x129   :  { %v3511_v13 = vcombine.low %v202_v5, %v210_v6 }
 0x12b   :  { %1114 = vmatpush1.bf16.msra.mxu0 %v3505_v15  ;;  %1155 = vmatpush1.bf16.msra.mxu1 %v3507_v16  ;;  %v4167_v15 = vld [vmem:[#allocation9 + $0x140] sm:$0xff]  }
 0x12c   :  { %1181 = vmatprep.subr.bf16.mxu0 %v3398_v17  ;;  %1222 = vmatprep.subr.bf16.mxu1 %v3400_v18  ;;  %v4168_v16 = vld [vmem:[#allocation9 + $0xc0] sm:$0xff]   ;;  %v4169_v17 = vld [vmem:[#allocation9 + $0x108] sm:$0xff]  }
 0x12d   :  { %v4170_v18 = vld [vmem:[#allocation9 + $0x148] sm:$0xff]  }
 0x12e   :  { %1132 = vmatmul.mubr.bf16.vlgmr.msra.gmra.mrb[8].mxu0 %v4612_v21  ;;  %1173 = vmatmul.mubr.bf16.vlgmr.msra.gmra.mrb[8].mxu1 %v4612_v21 }
 0x12f   :  { %1182 = vmatpush1.bf16.msra.mxu0 %v3397_v24  ;;  %1223 = vmatpush1.bf16.msra.mxu1 %v3399_v25  ;;  %v4175_v24 = vld [vmem:[#allocation9 + $0x118] sm:$0xff]  }
 0x130   :  { %1183 = vmatprep.subr.bf16.mxu0 %v3414_v26  ;;  %1224 = vmatprep.subr.bf16.mxu1 %v3416_v27  ;;  %v4176_v25 = vld [vmem:[#allocation9 + $0x158] sm:$0xff]   ;;  %v4179_v27 = vld [vmem:[#allocation9 + $0x160] sm:$0xff]  }
 0x131   :  { %1213 = vmatprep.mubr.bf16.mxu0 %v4469_v11  ;;  %1254 = vmatprep.mubr.bf16.mxu1 %v4469_v11  ;;  %v3464_v11 = vcombine.high %v154_v45, %v162_v46  ;;  %v4177_v26 = vld [vmem:[#allocation9 + $0xd8] sm:$0xff]  }
 0x133   :  { %1184 = vmatpush1.bf16.msra.mxu0 %v3413_v31  ;;  %1225 = vmatpush1.bf16.msra.mxu1 %v3415_v32  ;;  %v4184_v31 = vld [vmem:[#allocation9 + $0x130] sm:$0xff]  }
 0x134   :  { %1185 = vmatprep.subr.bf16.mxu0 %v3430_v33  ;;  %1226 = vmatprep.subr.bf16.mxu1 %v3432_v34  ;;  %v4185_v32 = vld [vmem:[#allocation9 + $0x170] sm:$0xff]   ;;  %v4187_v34 = vld [vmem:[#allocation9 + $0x138] sm:$0xff]  }
 0x135   :  { %v4186_v33 = vld [vmem:[#allocation9 + $0xf0] sm:$0xff]  }
 0x137   :  { %1186 = vmatpush1.bf16.msra.mxu0 %v3429_v39  ;;  %1227 = vmatpush1.bf16.msra.mxu1 %v3431_v40  ;;  %v215_v39 = vlaneseq }
 0x138   :  { %1187 = vmatprep.subr.bf16.mxu0 %v3446_v41  ;;  %1228 = vmatprep.subr.bf16.mxu1 %v3448_v42 }
 0x139   :  { %v4628_v40 = vshrl.u32 %v215_v39, 7 }
 0x13b   :  { %1188 = vmatpush1.bf16.msra.mxu0 %v3445_v47  ;;  %1229 = vmatpush1.bf16.msra.mxu1 %v3447_v48  ;;  %v217_v41 = vsub.s32 0, %v4628_v40  ;;  %v225_v42 = vsub.s32 2, %v4628_v40  ;;  %v221_v44 = vsub.s32 1, %v4628_v40  ;;  %v229_v45 = vsub.s32 3, %v4628_v40 }
 0x13c   :  { %1189 = vmatprep.subr.bf16.mxu0 %v3462_v49  ;;  %1230 = vmatprep.subr.bf16.mxu1 %v3464_v11 }
 0x13d   :  { %v218_v46 = vrot.slane %v4632_v43, %v217_v41  ;;  %v226_v47 = vrot.slane %v4632_v43, %v225_v42  ;;  %v222_v48 = vrot.slane %v4632_v43, %v221_v44  ;;  %v230_v49 = vrot.slane %v4632_v43, %v229_v45 }
 0x13f   :  { %1190 = vmatpush1.bf16.msra.mxu0 %v3461_v54  ;;  %1231 = vmatpush1.bf16.msra.mxu1 %v3463_v55 }
 0x140   :  { %1191 = vmatprep.subr.bf16.mxu0 %v3478_v56  ;;  %1232 = vmatprep.subr.bf16.mxu1 %v3480_v57 }
 0x143   :  { %1192 = vmatpush1.bf16.msra.mxu0 %v3477_v62  ;;  %1233 = vmatpush1.bf16.msra.mxu1 %v3479_v63 }
 0x144   :  { %1193 = vmatprep.subr.bf16.mxu0 %v3494_v1  ;;  %1234 = vmatprep.subr.bf16.mxu1 %v3496_v2 }
 0x147   :  { %1194 = vmatpush1.bf16.msra.mxu0 %v3493_v7  ;;  %1235 = vmatpush1.bf16.msra.mxu1 %v3495_v8 }
 0x148   :  { %1195 = vmatprep.subr.bf16.mxu0 %v3510_v9  ;;  %1236 = vmatprep.subr.bf16.mxu1 %v3512_v10  ;;  %v4203_v9 = vld [vmem:[#allocation9 + $0x180] sm:$0xff]  }
 0x14b   :  { %1196 = vmatpush1.bf16.msra.mxu0 %v3509_v12  ;;  %1237 = vmatpush1.bf16.msra.mxu1 %v3511_v13  ;;  %v4208_v12 = vld [vmem:[#allocation9 + $0x1c8] sm:$0xff]  }
 0x14c   :  { %3725 = vmatprep.subr.bf16.mxu0 %v4166_v14  ;;  %3965 = vmatprep.subr.bf16.mxu1 %v4167_v15  ;;  %v4213_v14 = vld [vmem:[#allocation9] sm:$0xff]  }
 0x14e   :  { %1214 = vmatmul.mubr.bf16.vlgmr.msra.gmra.mrb[12].mxu0 %v4612_v21  ;;  %1255 = vmatmul.mubr.bf16.vlgmr.msra.gmra.mrb[12].mxu1 %v4612_v21  ;;  %v4178_v21 = vld [vmem:[#allocation9 + $0x120] sm:$0xff]  }
 0x14f   :  { %3726 = vmatpush3.bf16.msra.mxu0 %v4168_v16  ;;  %3966 = vmatpush3.bf16.msra.mxu1 %v4167_v15  ;;  %v4216_v16 = vld [vmem:[#allocation9 + $0x48] sm:$0xff]  }
 0x150   :  { %3727 = vmatprep.subr.bf16.mxu0 %v4169_v17  ;;  %3967 = vmatprep.subr.bf16.mxu1 %v4170_v18 }
 0x153   :  { %3728 = vmatpush3.bf16.msra.mxu0 %v4171_v19  ;;  %3968 = vmatpush3.bf16.msra.mxu1 %v4170_v18  ;;  %v4210_v19 = vld [vmem:[#allocation9 + $0x188] sm:$0xff]  }
 0x154   :  { %3729 = vmatprep.subr.bf16.mxu0 %v4172_v20  ;;  %3969 = vmatprep.subr.bf16.mxu1 %v4173_v22  ;;  %v4214_v20 = vld [vmem:[#allocation9 + $0x1d0] sm:$0xff]  }
 0x157   :  { %3730 = vmatpush3.bf16.msra.mxu0 %v4174_v23  ;;  %3970 = vmatpush3.bf16.msra.mxu1 %v4173_v22  ;;  %v4217_v22 = vld [vmem:[#allocation9 + $0x8] sm:$0xff]   ;;  %v4218_v23 = vld [vmem:[#allocation9 + $0x50] sm:$0xff]  }
 0x158   :  { %3731 = vmatprep.subr.bf16.mxu0 %v4175_v24  ;;  %3971 = vmatprep.subr.bf16.mxu1 %v4176_v25  ;;  %v233_v24 = vsub.s32 4, %v4628_v40 }
 0x15b   :  { %3732 = vmatpush3.bf16.msra.mxu0 %v4177_v26  ;;  %3972 = vmatpush3.bf16.msra.mxu1 %v4176_v25  ;;  %v4215_v25 = vld [vmem:[#allocation9 + $0x190] sm:$0xff]   ;;  %v4220_v26 = vld [vmem:[#allocation9 + $0x1d8] sm:$0xff]  }
 0x15c   :  { %3733 = vmatprep.subr.bf16.mxu0 %v4178_v21  ;;  %3973 = vmatprep.subr.bf16.mxu1 %v4179_v27 }
 0x15f   :  { %3734 = vmatpush3.bf16.msra.mxu0 %v4180_v28  ;;  %3974 = vmatpush3.bf16.msra.mxu1 %v4179_v27  ;;  %v241_v27 = vsub.s32 6, %v4628_v40  ;;  %v237_v28 = vsub.s32 5, %v4628_v40 }
 0x160   :  { %3735 = vmatprep.subr.bf16.mxu0 %v4181_v29  ;;  %3975 = vmatprep.subr.bf16.mxu1 %v4182_v30  ;;  %v245_v29 = vsub.s32 7, %v4628_v40 }
 0x163   :  { %3736 = vmatpush3.bf16.msra.mxu0 %v4183_v0  ;;  %3976 = vmatpush3.bf16.msra.mxu1 %v4182_v30  ;;  %v4219_v30 = vld [vmem:[#allocation9 + $0x10] sm:$0xff]   ;;  %v4222_v0 = vld [vmem:[#allocation9 + $0x58] sm:$0xff]  }
 0x164   :  { %3737 = vmatprep.subr.bf16.mxu0 %v4184_v31  ;;  %3977 = vmatprep.subr.bf16.mxu1 %v4185_v32  ;;  %v4221_v31 = vld [vmem:[#allocation9 + $0x198] sm:$0xff]  }
 0x167   :  { %3738 = vmatpush3.bf16.msra.mxu0 %v4186_v33  ;;  %3978 = vmatpush3.bf16.msra.mxu1 %v4185_v32  ;;  %v234_v32 = vrot.slane %v4632_v43, %v233_v24  ;;  %v242_v33 = vrot.slane %v4632_v43, %v241_v27 }
 0x168   :  { %3739 = vmatprep.subr.bf16.mxu0 %v4187_v34  ;;  %3979 = vmatprep.subr.bf16.mxu1 %v4188_v35  ;;  %v4226_v34 = vld [vmem:[#allocation9 + $0x1e0] sm:$0xff]  }
 0x16b   :  { %3740 = vmatpush3.bf16.msra.mxu0 %v4189_v36  ;;  %3980 = vmatpush3.bf16.msra.mxu1 %v4188_v35  ;;  %v238_v35 = vrot.slane %v4632_v43, %v237_v28  ;;  %v246_v36 = vrot.slane %v4632_v43, %v245_v29  ;;  %v4225_v43 = vld [vmem:[#allocation9 + $0x20] sm:$0xff]  }
 0x16c   :  { %3885 = vmatprep.subr.bf16.mxu0 %v4202_v37  ;;  %3805 = vmatprep.subr.bf16.mxu1 %v4211_v38  ;;  %v4223_v37 = vld [vmem:[#allocation9 + $0x18] sm:$0xff]   ;;  %v4224_v38 = vld [vmem:[#allocation9 + $0x60] sm:$0xff]  }
 0x1c1   :  { %v969_v11 = vpop.f32.mrb[0].mxu0  ;;  %v1010_v50 = vpop.f32.mrb[0].mxu1 }
 0x1c2   :  { %v970_v51 = vadd.f32 %v969_v11, %v218_v46  ;;  %v1011_v52 = vadd.f32 %v1010_v50, %v226_v47  ;;  %v971_v53 = vpop.f32.mrb[1].mxu0  ;;  %v1012_v54 = vpop.f32.mrb[1].mxu1  ;;  %v4227_v47 = vld [vmem:[#allocation9 + $0x1a0] sm:$0xff]  }
 0x1c3   :  { %v972_v55 = vadd.f32 %v971_v53, %v222_v48  ;;  %v1013_v56 = vadd.f32 %v1012_v54, %v230_v49  ;;  %v973_v57 = vpop.f32.mrb[2].mxu0  ;;  %v1014_v58 = vpop.f32.mrb[2].mxu1 }
 0x1c4   :  { %vm1263_vm0 = vcmp.ge.f32.partialorder %v970_v51, 0.0  ;;  %v1279_v59 = vmul.f32 0.2, %v970_v51  ;;  %vm1265_vm1 = vcmp.ge.f32.partialorder %v1011_v52, 0.0  ;;  %v1281_v60 = vmul.f32 0.2, %v1011_v52 }
 0x1c5   :  { %vm1264_vm2 = vcmp.ge.f32.partialorder %v972_v55, 0.0  ;;  %v1280_v61 = vmul.f32 0.2, %v972_v55  ;;  %vm1266_vm3 = vcmp.ge.f32.partialorder %v1013_v56, 0.0  ;;  %v1282_v62 = vmul.f32 0.2, %v1013_v56 }
 0x1c6   :  { %v1295_v63 = vsel %vm1263_vm0, %v970_v51, %v1279_v59  ;;  %v1297_v1 = vsel %vm1265_vm1, %v1011_v52, %v1281_v60  ;;  %v974_v2 = vpop.f32.mrb[3].mxu0  ;;  %v1015_v3 = vpop.f32.mrb[3].mxu1  ;;  %v4236_v51 = vld [vmem:[#allocation9 + $0x1e8] sm:$0xff]  }
 0x1c7   :  { %v1347_v4 = vpack.c.bf16 %v1295_v63, %v1295_v63  ;;  %v1296_v5 = vsel %vm1264_vm2, %v972_v55, %v1280_v61  ;;  %v1298_v6 = vsel %vm1266_vm3, %v1013_v56, %v1282_v62  ;;  %v4228_v56 = vld [vmem:[#allocation9 + $0x68] sm:$0xff]   ;;  %v4245_v3 = vld [vmem:[#allocation9 + $0x1f0] sm:$0xff]  }
 0x1c8   :  { %v3661_v7 = vpack.c.bf16 %v1297_v1, %v1296_v5  ;;  %v1356_v8 = vpack.c.bf16 %v1298_v6, %v1298_v6  ;;  %v4238_v57 = vld [vmem:[#allocation9 + $0x1a8] sm:$0xff]  }
 0x1c9   :  { %1349 = vst [vmem:[#allocation2 + $0x1c] sm:$0xf] %v1347_v4 }
 0x1ca   :  { %3662 = vst [vmem:[#allocation2 + $0x20] sm:$0xff] %v3661_v7   ;;  %1358 = vst [vmem:[#allocation2 + $0x28] sm:$0xf] %v1356_v8  ;;  %v4229_v7 = vld [vmem:[#allocation9 + $0x28] sm:$0xff]  }
 0x1d0   :  { %v4192_v10 = vld [vmem:[#allocation2 + $0x18] sm:$0xff]  }
 0x1d1   :  { %v4190_v13 = vld [vmem:[#allocation2 + $0x1c] sm:$0xff]   ;;  %v4193_v17 = vld [vmem:[#allocation2 + $0x28] sm:$0xff]  }
 0x1d2   :  { %v4191_v15 = vld [vmem:[#allocation2 + $0x20] sm:$0xff]   ;;  %2055 = vmatprep.mubr.bf16.mxu0 %v4190_v13 }
 0x1d3   :  { %3981 = vmatprep.mubr.bf16.mxu1 %v4191_v15  ;;  %2056 = vmatmul.mubr.bf16.vlgmr.msra.gmra.mrb[16].mxu0 %v4192_v10  ;;  %v4194_v18 = vld [vmem:[#allocation2 + $0x24] sm:$0xff]   ;;  %v4232_v10 = vld [vmem:[#allocation9 + $0x70] sm:$0xff]  }
 0x1d4   :  { %3982 = vmatmul.mubr.bf16.vlgmr.msra.gmra.mrb[16].mxu1 %v4193_v17  ;;  %3886 = vmatpush3.bf16.msra.mxu0 %v4203_v9  ;;  %v4195_v21 = vld [vmem:[#allocation2 + $0x20] sm:$0xff]   ;;  %v4664_v17 = vld [vmem:[#allocation9 + $0x200] sm:$0xff]  }
 0x1d5   :  { %2063 = vmatprep.mubr.bf16.mxu0 %v4194_v18  ;;  %3887 = vmatprep.subr.bf16.mxu0 %v4208_v12  ;;  %v4246_v12 = vld [vmem:[#allocation9 + $0x1b0] sm:$0xff]   ;;  %v4248_v13 = vld [vmem:[#allocation9 + $0x1f8] sm:$0xff]  }
 0x1d6   :  { %3806 = vmatpush3.bf16.msra.mxu1 %v4213_v14  ;;  %v4235_v14 = vld [vmem:[#allocation9 + $0x30] sm:$0xff]   ;;  %v4239_v15 = vld [vmem:[#allocation9 + $0x78] sm:$0xff]  }
 0x1d7   :  { %3807 = vmatprep.subr.bf16.mxu1 %v4216_v16  ;;  %v4249_v16 = vld [vmem:[#allocation9 + $0x1b8] sm:$0xff]  }
 0x1d8   :  { %3888 = vmatpush3.bf16.msra.mxu0 %v4210_v19  ;;  %v4240_v18 = vld [vmem:[#allocation9 + $0x38] sm:$0xff]   ;;  %v4666_v19 = vld [vmem:[#allocation9 + $0x80] sm:$0xff]  }
 0x1d9   :  { %3889 = vmatprep.subr.bf16.mxu0 %v4214_v20 }
 0x1da   :  { %3808 = vmatpush3.bf16.msra.mxu1 %v4217_v22 }
 0x1db   :  { %2064 = vmatmul.mubr.bf16.gmra.mrb[20].mxu0 %v4195_v21  ;;  %3809 = vmatprep.subr.bf16.mxu1 %v4218_v23 }
 0x1dc   :  { %3890 = vmatpush3.bf16.msra.mxu0 %v4215_v25 }
 0x1dd   :  { %3891 = vmatprep.subr.bf16.mxu0 %v4220_v26 }
 0x1de   :  { %3810 = vmatpush3.bf16.msra.mxu1 %v4219_v30  ;;  %v212_v30 = vld [vmem:[#allocation8 + $0x8] sm:$0xff] }
 0x1df   :  { %3811 = vmatprep.subr.bf16.mxu1 %v4222_v0  ;;  %v250_v0 = vrot.slane %v212_v30, %v217_v41 }
 0x1e0   :  { %3892 = vmatpush3.bf16.msra.mxu0 %v4221_v31  ;;  %v258_v31 = vrot.slane %v212_v30, %v225_v42 }
 0x1e1   :  { %v1051_v39 = vpop.f32.mrb[4].mxu0  ;;  %v1092_v46 = vpop.f32.mrb[4].mxu1  ;;  %3893 = vmatprep.subr.bf16.mxu0 %v4226_v34 }
 0x1e2   :  { %v1052_v48 = vadd.f32 %v1051_v39, %v234_v32  ;;  %v1093_v49 = vadd.f32 %v1092_v46, %v242_v33  ;;  %v1053_v11 = vpop.f32.mrb[5].mxu0  ;;  %v1094_v50 = vpop.f32.mrb[5].mxu1  ;;  %3812 = vmatpush3.bf16.msra.mxu1 %v4223_v37  ;;  %v254_v32 = vrot.slane %v212_v30, %v221_v44  ;;  %v262_v33 = vrot.slane %v212_v30, %v229_v45 }
 0x1e3   :  { %v1054_v52 = vadd.f32 %v1053_v11, %v238_v35  ;;  %v1095_v53 = vadd.f32 %v1094_v50, %v246_v36  ;;  %v1055_v54 = vpop.f32.mrb[6].mxu0  ;;  %v1096_v55 = vpop.f32.mrb[6].mxu1  ;;  %3813 = vmatprep.subr.bf16.mxu1 %v4224_v38 }
 0x1e4   :  { %vm1267_vm4 = vcmp.ge.f32.partialorder %v1052_v48, 0.0  ;;  %v1283_v58 = vmul.f32 0.2, %v1052_v48  ;;  %vm1269_vm5 = vcmp.ge.f32.partialorder %v1093_v49, 0.0  ;;  %v1285_v59 = vmul.f32 0.2, %v1093_v49  ;;  %3894 = vmatpush3.bf16.msra.mxu0 %v4227_v47 }
 0x1e5   :  { %vm1268_vm6 = vcmp.ge.f32.partialorder %v1054_v52, 0.0  ;;  %v1284_v60 = vmul.f32 0.2, %v1054_v52  ;;  %vm1270_vm7 = vcmp.ge.f32.partialorder %v1095_v53, 0.0  ;;  %v1286_v61 = vmul.f32 0.2, %v1095_v53  ;;  %3895 = vmatprep.subr.bf16.mxu0 %v4236_v51 }
 0x1e6   :  { %v1299_v62 = vsel %vm1267_vm4, %v1052_v48, %v1283_v58  ;;  %v1301_v63 = vsel %vm1269_vm5, %v1093_v49, %v1285_v59  ;;  %v1056_v1 = vpop.f32.mrb[7].mxu0  ;;  %v1097_v2 = vpop.f32.mrb[7].mxu1  ;;  %3814 = vmatpush3.bf16.msra.mxu1 %v4225_v43 }
 0x1e7   :  { %v1359_v4 = vpack.c.bf16 %v1299_v62, %v1299_v62  ;;  %v1300_v5 = vsel %vm1268_vm6, %v1054_v52, %v1284_v60  ;;  %v1302_v6 = vsel %vm1270_vm7, %v1095_v53, %v1286_v61  ;;  %3815 = vmatprep.subr.bf16.mxu1 %v4228_v56  ;;  %v274_v1 = vrot.slane %v212_v30, %v241_v27 }
 0x1e8   :  { %v3666_v8 = vpack.c.bf16 %v1301_v63, %v1300_v5  ;;  %v1368_v9 = vpack.c.bf16 %v1302_v6, %v1302_v6  ;;  %3896 = vmatpush3.bf16.msra.mxu0 %v4238_v57  ;;  %v266_v63 = vrot.slane %v212_v30, %v233_v24  ;;  %v270_v2 = vrot.slane %v212_v30, %v237_v28 }
 0x1e9   :  { %1361 = vst [vmem:[#allocation2 + $0x34] sm:$0xf] %v1359_v4  ;;  %3897 = vmatprep.subr.bf16.mxu0 %v4245_v3  ;;  %v278_v3 = vrot.slane %v212_v30, %v245_v29  ;;  %v4241_v30 = vld [vmem:[#allocation2 + $0x4] sm:$0xff]  }
 0x1ea   :  { %3667 = vst [vmem:[#allocation2 + $0x38] sm:$0xff] %v3666_v8   ;;  %1370 = vst [vmem:[#allocation2 + $0x40] sm:$0xf] %v1368_v9  ;;  %3816 = vmatpush3.bf16.msra.mxu1 %v4229_v7 }
 0x1eb   :  { %3817 = vmatprep.subr.bf16.mxu1 %v4232_v10 }
 0x1ec   :  { %3898 = vmatpush3.bf16.msra.mxu0 %v4246_v12 }
 0x1ed   :  { %3899 = vmatprep.subr.bf16.mxu0 %v4248_v13 }
 0x1ee   :  { %3818 = vmatpush3.bf16.msra.mxu1 %v4235_v14 }
 0x1ef   :  { %3819 = vmatprep.subr.bf16.mxu1 %v4239_v15 }
 0x1f0   :  { %v4198_v20 = vld [vmem:[#allocation2 + $0x30] sm:$0xff]   ;;  %3900 = vmatpush3.bf16.msra.mxu0 %v4249_v16 }
 0x1f1   :  { %v4196_v22 = vld [vmem:[#allocation2 + $0x34] sm:$0xff]   ;;  %4029 = vmatprep.subr.bf16.mxu0 %v4664_v17  ;;  %v4199_v25 = vld [vmem:[#allocation2 + $0x40] sm:$0xff]  }
 0x1f2   :  { %v4197_v23 = vld [vmem:[#allocation2 + $0x38] sm:$0xff]   ;;  %2071 = vmatprep.mubr.bf16.mxu0 %v4196_v22  ;;  %3820 = vmatpush3.bf16.msra.mxu1 %v4240_v18 }
 0x1f3   :  { %3985 = vmatprep.mubr.bf16.mxu1 %v4197_v23  ;;  %2072 = vmatmul.mubr.bf16.gmra.mrb[24].mxu0 %v4198_v20  ;;  %v4200_v26 = vld [vmem:[#allocation2 + $0x3c] sm:$0xff]  }
 0x1f4   :  { %3986 = vmatmul.mubr.bf16.gmra.mrb[20].mxu1 %v4199_v25  ;;  %3997 = vmatprep.subr.bf16.mxu1 %v4666_v19  ;;  %v4201_v21 = vld [vmem:[#allocation2 + $0x38] sm:$0xff]  }
 0x1f5   :  { %2079 = vmatprep.mubr.bf16.mxu0 %v4200_v26 }
 0x1fb   :  { %2080 = vmatmul.mubr.bf16.gmra.mrb[28].mxu0 %v4201_v21 }
 0x201   :  { %v1133_v34 = vpop.f32.mrb[8].mxu0  ;;  %v1174_v35 = vpop.f32.mrb[8].mxu1 }
 0x202   :  { %v1134_v36 = vadd.f32 %v1133_v34, %v250_v0  ;;  %v1175_v37 = vadd.f32 %v1174_v35, %v258_v31  ;;  %v1135_v38 = vpop.f32.mrb[9].mxu0  ;;  %v1176_v39 = vpop.f32.mrb[9].mxu1  ;;  %v4244_v34 = vld [vmem:[#allocation2] sm:$0xff]  }
 0x203   :  { %v1136_v46 = vadd.f32 %v1135_v38, %v254_v32  ;;  %v1177_v47 = vadd.f32 %v1176_v39, %v262_v33  ;;  %v1137_v48 = vpop.f32.mrb[10].mxu0  ;;  %v1178_v49 = vpop.f32.mrb[10].mxu1  ;;  %v4251_v38 = vld [vmem:[#allocation9 + $0x88] sm:$0xff]   ;;  %v4256_v39 = vld [vmem:[#allocation9 + $0x90] sm:$0xff]  }
 0x204   :  { %vm1271_vm8 = vcmp.ge.f32.partialorder %v1134_v36, 0.0  ;;  %v1287_v41 = vmul.f32 0.2, %v1134_v36  ;;  %vm1273_vm9 = vcmp.ge.f32.partialorder %v1175_v37, 0.0  ;;  %v1289_v42 = vmul.f32 0.2, %v1175_v37 }
 0x205   :  { %vm1272_vm10 = vcmp.ge.f32.partialorder %v1136_v46, 0.0  ;;  %v1288_v11 = vmul.f32 0.2, %v1136_v46  ;;  %vm1274_vm11 = vcmp.ge.f32.partialorder %v1177_v47, 0.0  ;;  %v1290_v44 = vmul.f32 0.2, %v1177_v47 }
 0x206   :  { %v1303_v50 = vsel %vm1271_vm8, %v1134_v36, %v1287_v41  ;;  %v1305_v45 = vsel %vm1273_vm9, %v1175_v37, %v1289_v42  ;;  %v1138_v51 = vpop.f32.mrb[11].mxu0  ;;  %v1179_v52 = vpop.f32.mrb[11].mxu1  ;;  %v4250_v36 = vld [vmem:[#allocation2 + $0xc] sm:$0xff]   ;;  %v4247_v37 = vld [vmem:[#allocation2 + $0x34] sm:$0xff]   ;;  %v4255_v48 = vld [vmem:[#allocation2 + $0x3c] sm:$0xff]  }
 0x207   :  { %v1371_v53 = vpack.c.bf16 %v1303_v50, %v1303_v50  ;;  %v1304_v54 = vsel %vm1272_vm10, %v1136_v46, %v1288_v11  ;;  %v1306_v55 = vsel %vm1274_vm11, %v1177_v47, %v1290_v44  ;;  %v4252_v46 = vld [vmem:[#allocation2 + $0x8] sm:$0xff]   ;;  %v4253_v47 = vld [vmem:[#allocation2 + $0x30] sm:$0xff]   ;;  %v4262_v49 = vld [vmem:[#allocation9 + $0x98] sm:$0xff]  }
 0x208   :  { %v3671_v43 = vpack.c.bf16 %v1305_v45, %v1304_v54  ;;  %v1380_v56 = vpack.c.bf16 %v1306_v55, %v1306_v55  ;;  %v4254_v41 = vld [vmem:[#allocation2 + $0x1c] sm:$0xff]   ;;  %v4687_v42 = vld [vmem:[#allocation9 + $0x208] sm:$0xff]   ;;  %v4260_v52 = vld [vmem:[#allocation2 + $0x24] sm:$0xff]  }
 0x209   :  { %1373 = vst [vmem:[#allocation2 + $0x4c] sm:$0xf] %v1371_v53  ;;  %v4691_v11 = vld [vmem:[#allocation9 + $0x210] sm:$0xff]   ;;  %v4274_v51 = vld [vmem:[#allocation9 + $0xa8] sm:$0xff]   ;;  %v4695_v53 = vld [vmem:[#allocation9 + $0x218] sm:$0xff]  }
 0x20a   :  { %3672 = vst [vmem:[#allocation2 + $0x50] sm:$0xff] %v3671_v43   ;;  %1382 = vst [vmem:[#allocation2 + $0x58] sm:$0xf] %v1380_v56  ;;  %v4258_v44 = vld [vmem:[#allocation2 + $0x38] sm:$0xff]   ;;  %v4699_v55 = vld [vmem:[#allocation9 + $0x220] sm:$0xff]  }
 0x20b   :  { %v4257_v50 = vld [vmem:[#allocation2 + $0x18] sm:$0xff]   ;;  %v4263_v56 = vld [vmem:[#allocation2 + $0x20] sm:$0xff]  }
 0x20c   :  { %v4280_v54 = vld [vmem:[#allocation9 + $0xb0] sm:$0xff]  }
 0x210   :  { %v4206_v57 = vld [vmem:[#allocation2 + $0x48] sm:$0xff]  }
 0x211   :  { %v4204_v58 = vld [vmem:[#allocation2 + $0x4c] sm:$0xff]   ;;  %v4207_v60 = vld [vmem:[#allocation2 + $0x58] sm:$0xff]  }
 0x212   :  { %v4205_v59 = vld [vmem:[#allocation2 + $0x50] sm:$0xff]   ;;  %2087 = vmatprep.mubr.bf16.mxu0 %v4204_v58  ;;  %v4264_v43 = vld [vmem:[#allocation2 + $0x48] sm:$0xff]   ;;  %v4285_v58 = vld [vmem:[#allocation9 + $0xb8] sm:$0xff]  }
 0x213   :  { %3989 = vmatprep.mubr.bf16.mxu1 %v4205_v59  ;;  %2088 = vmatmul.mubr.bf16.gmra.mrb[32].mxu0 %v4206_v57  ;;  %v4209_v61 = vld [vmem:[#allocation2 + $0x54] sm:$0xff]   ;;  %v4261_v45 = vld [vmem:[#allocation2 + $0x4c] sm:$0xff]  }
 0x214   :  { %3990 = vmatmul.mubr.bf16.gmra.mrb[24].mxu1 %v4207_v60  ;;  %2095 = vmatprep.mubr.bf16.mxu0 %v4209_v61  ;;  %v4212_v62 = vld [vmem:[#allocation2 + $0x50] sm:$0xff]   ;;  %v4707_v61 = vld [vmem:[#allocation9 + $0x230] sm:$0xff]  }
 0x215   :  { %v4267_v57 = vld [vmem:[#allocation2 + $0x54] sm:$0xff]  }
 0x216   :  { %v4266_v59 = vld [vmem:[#allocation2 + $0x34] sm:$0xff]  }
 0x217   :  { %v4703_v60 = vld [vmem:[#allocation9 + $0x228] sm:$0xff]  }
 0x21b   :  { %2096 = vmatmul.mubr.bf16.gmra.mrb[36].mxu0 %v4212_v62  ;;  %v4270_v62 = vld [vmem:[#allocation2 + $0x50] sm:$0xff]  }
 0x221   :  { %v1215_v4 = vpop.f32.mrb[12].mxu0  ;;  %v1256_v5 = vpop.f32.mrb[12].mxu1 }
 0x222   :  { %v1216_v6 = vadd.f32 %v1215_v4, %v266_v63  ;;  %v1257_v7 = vadd.f32 %v1256_v5, %v274_v1  ;;  %v1217_v8 = vpop.f32.mrb[13].mxu0  ;;  %v1258_v9 = vpop.f32.mrb[13].mxu1  ;;  %v4269_v63 = vld [vmem:[#allocation2 + $0x30] sm:$0xff]   ;;  %v4275_v5 = vld [vmem:[#allocation2 + $0x38] sm:$0xff]  }
 0x223   :  { %v1218_v10 = vadd.f32 %v1217_v8, %v270_v2  ;;  %v1259_v12 = vadd.f32 %v1258_v9, %v278_v3  ;;  %v1219_v13 = vpop.f32.mrb[14].mxu0  ;;  %v1260_v14 = vpop.f32.mrb[14].mxu1  ;;  %v4272_v2 = vld [vmem:[#allocation2 + $0x3c] sm:$0xff]  }
 0x224   :  { %vm1275_vm12 = vcmp.ge.f32.partialorder %v1216_v6, 0.0  ;;  %v1291_v24 = vmul.f32 0.2, %v1216_v6  ;;  %vm1277_vm13 = vcmp.ge.f32.partialorder %v1257_v7, 0.0  ;;  %v1293_v27 = vmul.f32 0.2, %v1257_v7 }
 0x225   :  { %vm1276_vm14 = vcmp.ge.f32.partialorder %v1218_v10, 0.0  ;;  %v1292_v15 = vmul.f32 0.2, %v1218_v10  ;;  %vm1278_vm15 = vcmp.ge.f32.partialorder %v1259_v12, 0.0  ;;  %v1294_v28 = vmul.f32 0.2, %v1259_v12 }
 0x226   :  { %v1307_v40 = vsel %vm1275_vm12, %v1216_v6, %v1291_v24  ;;  %v1309_v29 = vsel %vm1277_vm13, %v1257_v7, %v1293_v27  ;;  %v1220_v16 = vpop.f32.mrb[15].mxu0  ;;  %v1261_v18 = vpop.f32.mrb[15].mxu1  ;;  %v4712_v3 = vld [vmem:[#allocation9 + $0x238] sm:$0xff]   ;;  %v4278_v7 = vld [vmem:[#allocation2 + $0x4c] sm:$0xff]   ;;  %v4288_v13 = vld [vmem:[#allocation2 + $0x78] sm:$0xff]  }
 0x227   :  { %v1383_v20 = vpack.c.bf16 %v1307_v40, %v1307_v40  ;;  %v1308_v22 = vsel %vm1276_vm14, %v1218_v10, %v1292_v15  ;;  %v1310_v23 = vsel %vm1278_vm15, %v1259_v12, %v1294_v28  ;;  %v4286_v8 = vld [vmem:[#allocation2 + $0x7c] sm:$0xff]   ;;  %v4281_v10 = vld [vmem:[#allocation2 + $0x48] sm:$0xff]   ;;  %v4284_v12 = vld [vmem:[#allocation2 + $0x54] sm:$0xff]  }
 0x228   :  { %v3676_v25 = vpack.c.bf16 %v1309_v29, %v1308_v22  ;;  %v1392_v26 = vpack.c.bf16 %v1310_v23, %v1310_v23  ;;  %v4291_v14 = vld [vmem:[#allocation2 + $0x84] sm:$0xff]   ;;  %v4287_v27 = vld [vmem:[#allocation2 + $0x50] sm:$0xff]   ;;  %v4296_v40 = vld [vmem:[#allocation2 + $0x38] sm:$0xff]  }
 0x229   :  { %1385 = vst [vmem:[#allocation2 + $0x64] sm:$0xf] %v1383_v20  ;;  %v4290_v24 = vld [vmem:[#allocation2 + $0x8] sm:$0xff]   ;;  %v4293_v15 = vld [vmem:[#allocation2 + $0x80] sm:$0xff]   ;;  %v4292_v28 = vld [vmem:[#allocation2 + $0x10] sm:$0xff]  }
 0x22a   :  { %3677 = vst [vmem:[#allocation2 + $0x68] sm:$0xff] %v3676_v25   ;;  %1394 = vst [vmem:[#allocation2 + $0x70] sm:$0xf] %v1392_v26  ;;  %v4295_v29 = vld [vmem:[#allocation2 + $0x20] sm:$0xff]   ;;  %v4298_v18 = vld [vmem:[#allocation2 + $0x28] sm:$0xff]  }
 0x22b   :  { %v4299_v16 = vld [vmem:[#allocation2 + $0x40] sm:$0xff]   ;;  %v4301_v20 = vld [vmem:[#allocation2 + $0x50] sm:$0xff]   ;;  %v4300_v22 = vld [vmem:[#allocation2 + $0x38] sm:$0xff]  }
 0x22c   :  { %v4302_v23 = vld [vmem:[#allocation2 + $0x40] sm:$0xff]   ;;  %v4304_v25 = vld [vmem:[#allocation2 + $0x50] sm:$0xff]   ;;  %v4305_v26 = vld [vmem:[#allocation2 + $0x58] sm:$0xff]  }
 0x230   :  { %v4233_v21 = vld [vmem:[#allocation2 + $0x60] sm:$0xff]  }
 0x231   :  { %v4230_v0 = vld [vmem:[#allocation2 + $0x64] sm:$0xff]   ;;  %v4234_v32 = vld [vmem:[#allocation2 + $0x70] sm:$0xff]  }
 0x232   :  { %v4231_v31 = vld [vmem:[#allocation2 + $0x68] sm:$0xff]   ;;  %2103 = vmatprep.mubr.bf16.mxu0 %v4230_v0  ;;  %v4276_v4 = vld [vmem:[#allocation2 + $0x60] sm:$0xff]   ;;  %v4307_v0 = vld [vmem:[#allocation2 + $0x70] sm:$0xff]  }
 0x233   :  { %3993 = vmatprep.mubr.bf16.mxu1 %v4231_v31  ;;  %2104 = vmatmul.mubr.bf16.gmra.mrb[40].mxu0 %v4233_v21  ;;  %v4237_v33 = vld [vmem:[#allocation2 + $0x6c] sm:$0xff]   ;;  %v4273_v1 = vld [vmem:[#allocation2 + $0x64] sm:$0xff]  }
 0x234   :  { %3994 = vmatmul.mubr.bf16.gmra.mrb[28].mxu1 %v4234_v32  ;;  %2111 = vmatprep.mubr.bf16.mxu0 %v4237_v33  ;;  %v4243_v35 = vld [vmem:[#allocation2 + $0x68] sm:$0xff]  }
 0x235   :  { %2393 = vmatprep.mubr.bf16.mxu1 %v4241_v30  ;;  %v4279_v6 = vld [vmem:[#allocation2 + $0x6c] sm:$0xff]   ;;  %v4308_v30 = vld [vmem:[#allocation2 + $0x80] sm:$0xff]  }
 0x236   :  { %v4282_v9 = vld [vmem:[#allocation2 + $0x68] sm:$0xff]  }
 0x237   :  { %v4306_v21 = vld [vmem:[#allocation2 + $0x68] sm:$0xff]  }
 0x238   :  { %v4309_v31 = vld [vmem:[#allocation2 + $0x88] sm:$0xff]  }
 0x23b   :  { %2112 = vmatmul.mubr.bf16.gmra.mrb[44].mxu0 %v4243_v35 }
 0x23c   :  { %2394 = vmatmul.mubr.bf16.vlgmr.msra.gmra.mrb[32].mxu1 %v4244_v34  ;;  %2973 = vmatprep.mubr.bf16.mxu0 %v4247_v37 }
 0x23d   :  { %3998 = vmatpush3.bf16.msra.mxu1 %v4666_v19  ;;  %2401 = vmatprep.mubr.bf16.mxu1 %v4250_v36  ;;  %v4268_v19 = vld [vmem:[#allocation9 + $0xa0] sm:$0xff]  }
 0x23e   :  { %3999 = vmatprep.subr.bf16.mxu1 %v4251_v38 }
 0x241   :  { %4000 = vmatpush3.bf16.msra.mxu1 %v4251_v38 }
 0x242   :  { %4001 = vmatprep.subr.bf16.mxu1 %v4256_v39 }
 0x243   :  { %2974 = vmatmul.mubr.bf16.vlgmr.msra.gmra.mrb[48].mxu0 %v4253_v47 }
 0x244   :  { %2402 = vmatmul.mubr.bf16.gmra.mrb[36].mxu1 %v4252_v46  ;;  %2981 = vmatprep.mubr.bf16.mxu0 %v4255_v48 }
 0x245   :  { %2409 = vmatprep.mubr.bf16.mxu1 %v4254_v41  ;;  %4002 = vmatpush3.bf16.msra.mxu1 %v4256_v39 }
 0x246   :  { %4030 = vmatpush3.bf16.msra.mxu0 %v4664_v17  ;;  %4003 = vmatprep.subr.bf16.mxu1 %v4262_v49 }
 0x247   :  { %4031 = vmatprep.subr.bf16.mxu0 %v4687_v42 }
 0x249   :  { %4004 = vmatpush3.bf16.msra.mxu1 %v4262_v49 }
 0x24a   :  { %4032 = vmatpush3.bf16.msra.mxu0 %v4687_v42  ;;  %4005 = vmatprep.subr.bf16.mxu1 %v4268_v19 }
 0x24b   :  { %2982 = vmatmul.mubr.bf16.gmra.mrb[52].mxu0 %v4258_v44  ;;  %4033 = vmatprep.subr.bf16.mxu0 %v4691_v11 }
 0x24c   :  { %2410 = vmatmul.mubr.bf16.gmra.mrb[40].mxu1 %v4257_v50  ;;  %2989 = vmatprep.mubr.bf16.mxu0 %v4261_v45 }
 0x24d   :  { %2417 = vmatprep.mubr.bf16.mxu1 %v4260_v52  ;;  %4006 = vmatpush3.bf16.msra.mxu1 %v4268_v19 }
 0x24e   :  { %4034 = vmatpush3.bf16.msra.mxu0 %v4691_v11  ;;  %4007 = vmatprep.subr.bf16.mxu1 %v4274_v51 }
 0x24f   :  { %4035 = vmatprep.subr.bf16.mxu0 %v4695_v53 }
 0x251   :  { %4008 = vmatpush3.bf16.msra.mxu1 %v4274_v51 }
 0x252   :  { %4036 = vmatpush3.bf16.msra.mxu0 %v4695_v53  ;;  %4009 = vmatprep.subr.bf16.mxu1 %v4280_v54 }
 0x253   :  { %2990 = vmatmul.mubr.bf16.gmra.mrb[56].mxu0 %v4264_v43  ;;  %4037 = vmatprep.subr.bf16.mxu0 %v4699_v55 }
 0x254   :  { %2418 = vmatmul.mubr.bf16.gmra.mrb[44].mxu1 %v4263_v56  ;;  %2997 = vmatprep.mubr.bf16.mxu0 %v4267_v57 }
 0x255   :  { %2425 = vmatprep.mubr.bf16.mxu1 %v4266_v59  ;;  %4010 = vmatpush3.bf16.msra.mxu1 %v4280_v54 }
 0x256   :  { %4038 = vmatpush3.bf16.msra.mxu0 %v4699_v55  ;;  %4011 = vmatprep.subr.bf16.mxu1 %v4285_v58 }
 0x257   :  { %4039 = vmatprep.subr.bf16.mxu0 %v4703_v60 }
 0x259   :  { %4012 = vmatpush3.bf16.msra.mxu1 %v4285_v58 }
 0x25a   :  { %4040 = vmatpush3.bf16.msra.mxu0 %v4703_v60  ;;  %4061 = vmatprep.subr.bf16.mxu1 %v4664_v17 }
 0x25b   :  { %2998 = vmatmul.mubr.bf16.gmra.mrb[60].mxu0 %v4270_v62  ;;  %4041 = vmatprep.subr.bf16.mxu0 %v4707_v61 }
 0x25c   :  { %2426 = vmatmul.mubr.bf16.gmra.mrb[48].mxu1 %v4269_v63  ;;  %3005 = vmatprep.mubr.bf16.mxu0 %v4273_v1 }
 0x25d   :  { %2433 = vmatprep.mubr.bf16.mxu1 %v4272_v2 }
 0x25e   :  { %4042 = vmatpush3.bf16.msra.mxu0 %v4707_v61 }
 0x25f   :  { %4043 = vmatprep.subr.bf16.mxu0 %v4712_v3 }
 0x262   :  { %4044 = vmatpush3.bf16.msra.mxu0 %v4712_v3 }
 0x263   :  { %3006 = vmatmul.mubr.bf16.gmra.mrb[64].mxu0 %v4276_v4 }
 0x264   :  { %2434 = vmatmul.mubr.bf16.gmra.mrb[52].mxu1 %v4275_v5  ;;  %3013 = vmatprep.mubr.bf16.mxu0 %v4279_v6 }
 0x265   :  { %2441 = vmatprep.mubr.bf16.mxu1 %v4278_v7 }
 0x26b   :  { %3014 = vmatmul.mubr.bf16.gmra.mrb[68].mxu0 %v4282_v9 }
 0x26c   :  { %2442 = vmatmul.mubr.bf16.gmra.mrb[56].mxu1 %v4281_v10  ;;  %3021 = vmatprep.mubr.bf16.mxu0 %v4286_v8 }
 0x26d   :  { %2449 = vmatprep.mubr.bf16.mxu1 %v4284_v12 }
 0x273   :  { %3022 = vmatmul.mubr.bf16.gmra.mrb[72].mxu0 %v4288_v13 }
 0x274   :  { %2450 = vmatmul.mubr.bf16.gmra.mrb[60].mxu1 %v4287_v27  ;;  %3029 = vmatprep.mubr.bf16.mxu0 %v4291_v14 }
 0x275   :  { %4013 = vmatprep.mubr.bf16.mxu1 %v4290_v24 }
 0x27b   :  { %3030 = vmatmul.mubr.bf16.gmra.mrb[76].mxu0 %v4293_v15 }
 0x27c   :  { %4014 = vmatmul.mubr.bf16.vlgmr.msra.gmra.mrb[16].mxu1 %v4292_v28  ;;  %4045 = vmatprep.mubr.bf16.mxu0 %v4296_v40 }
 0x27d   :  { %4069 = vmatpush3.bf16.msra.mxu1 %v4664_v17  ;;  %4017 = vmatprep.mubr.bf16.mxu1 %v4295_v29  ;;  %v4303_v17 = vld [vmem:[#allocation2 + $0x58] sm:$0xff]  }
 0x27e   :  { %4062 = vmatprep.subr.bf16.mxu1 %v4687_v42 }
 0x281   :  { %4070 = vmatpush3.bf16.msra.mxu1 %v4687_v42 }
 0x282   :  { %4063 = vmatprep.subr.bf16.mxu1 %v4691_v11 }
 0x283   :  { %4046 = vmatmul.mubr.bf16.vlgmr.msra.gmra.mrb[80].mxu0 %v4299_v16 }
 0x284   :  { %4018 = vmatmul.mubr.bf16.gmra.mrb[20].mxu1 %v4298_v18  ;;  %4049 = vmatprep.mubr.bf16.mxu0 %v4301_v20 }
 0x285   :  { %4071 = vmatpush3.bf16.msra.mxu1 %v4691_v11  ;;  %4021 = vmatprep.mubr.bf16.mxu1 %v4300_v22 }
 0x286   :  { %4064 = vmatprep.subr.bf16.mxu1 %v4695_v53 }
 0x289   :  { %4072 = vmatpush3.bf16.msra.mxu1 %v4695_v53 }
 0x28a   :  { %4065 = vmatprep.subr.bf16.mxu1 %v4699_v55 }
 0x28b   :  { %4050 = vmatmul.mubr.bf16.gmra.mrb[84].mxu0 %v4303_v17 }
 0x28c   :  { %4022 = vmatmul.mubr.bf16.gmra.mrb[24].mxu1 %v4302_v23 }
 0x28d   :  { %4073 = vmatpush3.bf16.msra.mxu1 %v4699_v55  ;;  %4025 = vmatprep.mubr.bf16.mxu1 %v4304_v25 }
 0x28e   :  { %4066 = vmatprep.subr.bf16.mxu1 %v4703_v60 }
 0x291   :  { %4074 = vmatpush3.bf16.msra.mxu1 %v4703_v60 }
 0x292   :  { %4067 = vmatprep.subr.bf16.mxu1 %v4707_v61 }
 0x294   :  { %4026 = vmatmul.mubr.bf16.gmra.mrb[28].mxu1 %v4305_v26 }
 0x295   :  { %4075 = vmatpush3.bf16.msra.mxu1 %v4707_v61  ;;  %4053 = vmatprep.mubr.bf16.mxu1 %v4306_v21 }
 0x296   :  { %4068 = vmatprep.subr.bf16.mxu1 %v4712_v3 }
 0x299   :  { %4076 = vmatpush3.bf16.msra.mxu1 %v4712_v3 }
 0x29c   :  { %4054 = vmatmul.mubr.bf16.vlgmr.msra.gmra.mrb[24].mxu1 %v4307_v0 }
 0x29d   :  { %4057 = vmatprep.mubr.bf16.mxu1 %v4308_v30 }
 0x2a4   :  { %4058 = vmatmul.mubr.bf16.gmra.mrb[28].mxu1 %v4309_v31 }
 0x2a6   :  { %v3741_v32 = vpop.f32.mrb[16].mxu0 }
 0x2a7   :  { %v3742_v33 = vpop.f32.mrb[17].mxu0 }
 0x2a8   :  { %v3743_v34 = vadd.f32 %v3742_v33, %v3741_v32  ;;  %v3744_v35 = vpop.f32.mrb[18].mxu0 }
 0x2a9   :  { %v3745_v36 = vpop.f32.mrb[19].mxu0 }
 0x2aa   :  { %v3746_v37 = vadd.f32 %v3745_v36, %v3744_v35 }
 0x2ae   :  { %v3747_v38 = vpop.f32.mrb[20].mxu0 }
 0x2af   :  { %v3748_v39 = vpop.f32.mrb[21].mxu0 }
 0x2b0   :  { %v3749_v46 = vadd.f32 %v3748_v39, %v3747_v38  ;;  %v3750_v47 = vpop.f32.mrb[22].mxu0 }
 0x2b1   :  { %v3751_v48 = vpop.f32.mrb[23].mxu0 }
 0x2b2   :  { %v3752_v49 = vadd.f32 %v3751_v48, %v3750_v47 }
 0x2c6   :  { %v3753_v41 = vpop.f32.mrb[24].mxu0 }
 0x2c7   :  { %v3754_v42 = vpop.f32.mrb[25].mxu0 }
 0x2c8   :  { %v4732_v19 = vadd.f32 %v3754_v42, %v3753_v41  ;;  %v3756_v11 = vpop.f32.mrb[26].mxu0 }
 0x2c9   :  { %v3757_v44 = vpop.f32.mrb[27].mxu0 }
 0x2ca   :  { %v4734_v50 = vadd.f32 %v3757_v44, %v3756_v11 }
 0x2ce   :  { %v3759_v45 = vpop.f32.mrb[28].mxu0 }
 0x2cf   :  { %v3760_v51 = vpop.f32.mrb[29].mxu0 }
 0x2d0   :  { %v4736_v52 = vadd.f32 %v3760_v51, %v3759_v45  ;;  %v3762_v53 = vpop.f32.mrb[30].mxu0 }
 0x2d1   :  { %v3763_v54 = vpop.f32.mrb[31].mxu0 }
 0x2d2   :  { %v4738_v55 = vadd.f32 %v3763_v54, %v3762_v53 }
 0x2e6   :  { %v3765_v43 = vpop.f32.mrb[32].mxu0 }
 0x2e7   :  { %v3766_v56 = vpop.f32.mrb[33].mxu0 }
 0x2e8   :  { %v4740_v57 = vadd.f32 %v3766_v56, %v3765_v43  ;;  %v3768_v58 = vpop.f32.mrb[34].mxu0 }
 0x2e9   :  { %v3769_v59 = vpop.f32.mrb[35].mxu0 }
 0x2ea   :  { %v4742_v60 = vadd.f32 %v3769_v59, %v3768_v58 }
 0x2ee   :  { %v3771_v61 = vpop.f32.mrb[36].mxu0 }
 0x2ef   :  { %v3772_v62 = vpop.f32.mrb[37].mxu0 }
 0x2f0   :  { %v4744_v63 = vadd.f32 %v3772_v62, %v3771_v61  ;;  %v3774_v1 = vpop.f32.mrb[38].mxu0 }
 0x2f1   :  { %v3775_v2 = vpop.f32.mrb[39].mxu0 }
 0x2f2   :  { %v4746_v3 = vadd.f32 %v3775_v2, %v3774_v1 }
 0x306   :  { %v3777_v4 = vpop.f32.mrb[40].mxu0 }
 0x307   :  { %v3778_v5 = vpop.f32.mrb[41].mxu0 }
 0x308   :  { %v4748_v6 = vadd.f32 %v3778_v5, %v3777_v4  ;;  %v3780_v7 = vpop.f32.mrb[42].mxu0 }
 0x309   :  { %v3781_v8 = vpop.f32.mrb[43].mxu0 }
 0x30a   :  { %v4750_v9 = vadd.f32 %v3781_v8, %v3780_v7 }
 0x30e   :  { %v3783_v10 = vpop.f32.mrb[44].mxu0 }
 0x30f   :  { %v3821_v12 = vpop.f32.mrb[32].mxu1  ;;  %v3784_v13 = vpop.f32.mrb[45].mxu0 }
 0x310   :  { %v4752_v14 = vadd.f32 %v3784_v13, %v3783_v10  ;;  %v3822_v24 = vpop.f32.mrb[33].mxu1  ;;  %v3786_v27 = vpop.f32.mrb[46].mxu0 }
 0x311   :  { %v3823_v15 = vadd.f32 %v3822_v24, %v3821_v12  ;;  %v3824_v28 = vpop.f32.mrb[34].mxu1  ;;  %v3787_v40 = vpop.f32.mrb[47].mxu0 }
 0x312   :  { %v4754_v29 = vadd.f32 %v3787_v40, %v3786_v27  ;;  %v3825_v16 = vpop.f32.mrb[35].mxu1 }
 0x313   :  { %v3826_v18 = vadd.f32 %v3825_v16, %v3824_v28  ;;  %v4756_v20 = vadd.f32 %v3823_v15, %v3743_v34 }
 0x315   :  { %v4758_v22 = vadd.f32 %v3826_v18, %v3746_v37 }
 0x316   :  { %v3901_v17 = vpop.f32.mrb[48].mxu0 }
 0x317   :  { %v3827_v23 = vpop.f32.mrb[36].mxu1  ;;  %v3902_v25 = vpop.f32.mrb[49].mxu0 }
 0x318   :  { %v3828_v26 = vpop.f32.mrb[37].mxu1  ;;  %v4760_v21 = vadd.f32 %v3902_v25, %v3901_v17  ;;  %v3904_v30 = vpop.f32.mrb[50].mxu0 }
 0x319   :  { %v3829_v0 = vadd.f32 %v3828_v26, %v3827_v23  ;;  %v3830_v31 = vpop.f32.mrb[38].mxu1  ;;  %v3905_v32 = vpop.f32.mrb[51].mxu0 }
 0x31a   :  { %v3831_v33 = vpop.f32.mrb[39].mxu1  ;;  %v4762_v35 = vadd.f32 %v3905_v32, %v3904_v30 }
 0x31b   :  { %v3832_v36 = vadd.f32 %v3831_v33, %v3830_v31  ;;  %v4764_v38 = vadd.f32 %v3829_v0, %v3749_v46 }
 0x31d   :  { %v4766_v34 = vadd.f32 %v3832_v36, %v3752_v49 }
 0x31e   :  { %v3907_v37 = vpop.f32.mrb[52].mxu0 }
 0x31f   :  { %v3833_v39 = vpop.f32.mrb[40].mxu1  ;;  %v3908_v47 = vpop.f32.mrb[53].mxu0 }
 0x320   :  { %v3834_v48 = vpop.f32.mrb[41].mxu1  ;;  %v4768_v41 = vadd.f32 %v3908_v47, %v3907_v37  ;;  %v3910_v42 = vpop.f32.mrb[54].mxu0 }
 0x321   :  { %v3835_v11 = vadd.f32 %v3834_v48, %v3833_v39  ;;  %v3836_v44 = vpop.f32.mrb[42].mxu1  ;;  %v3911_v45 = vpop.f32.mrb[55].mxu0 }
 0x322   :  { %v3837_v51 = vpop.f32.mrb[43].mxu1  ;;  %v4770_v53 = vadd.f32 %v3911_v45, %v3910_v42 }
 0x323   :  { %v3838_v54 = vadd.f32 %v3837_v51, %v3836_v44  ;;  %v4773_v43 = vadd.f32 %v3835_v11, %v4732_v19 }
 0x325   :  { %v4776_v46 = vadd.f32 %v3838_v54, %v4734_v50 }
 0x326   :  { %v3913_v49 = vpop.f32.mrb[56].mxu0 }
 0x327   :  { %v3839_v56 = vpop.f32.mrb[44].mxu1  ;;  %v3914_v58 = vpop.f32.mrb[57].mxu0 }
 0x328   :  { %v3840_v59 = vpop.f32.mrb[45].mxu1  ;;  %v4778_v61 = vadd.f32 %v3914_v58, %v3913_v49  ;;  %v3916_v62 = vpop.f32.mrb[58].mxu0 }
 0x329   :  { %v3841_v1 = vadd.f32 %v3840_v59, %v3839_v56  ;;  %v3842_v2 = vpop.f32.mrb[46].mxu1  ;;  %v3917_v4 = vpop.f32.mrb[59].mxu0 }
 0x32a   :  { %v3843_v5 = vpop.f32.mrb[47].mxu1  ;;  %v4780_v7 = vadd.f32 %v3917_v4, %v3916_v62 }
 0x32b   :  { %v3844_v8 = vadd.f32 %v3843_v5, %v3842_v2  ;;  %v4783_v19 = vadd.f32 %v3841_v1, %v4736_v52 }
 0x32d   :  { %v4786_v50 = vadd.f32 %v3844_v8, %v4738_v55 }
 0x32e   :  { %v3919_v10 = vpop.f32.mrb[60].mxu0 }
 0x32f   :  { %v3845_v12 = vpop.f32.mrb[48].mxu1  ;;  %v3920_v13 = vpop.f32.mrb[61].mxu0 }
 0x330   :  { %v3846_v24 = vpop.f32.mrb[49].mxu1  ;;  %v4788_v27 = vadd.f32 %v3920_v13, %v3919_v10  ;;  %v3922_v15 = vpop.f32.mrb[62].mxu0 }
 0x331   :  { %v3847_v28 = vadd.f32 %v3846_v24, %v3845_v12  ;;  %v3848_v40 = vpop.f32.mrb[50].mxu1  ;;  %v3923_v16 = vpop.f32.mrb[63].mxu0 }
 0x332   :  { %v3849_v18 = vpop.f32.mrb[51].mxu1  ;;  %v4790_v17 = vadd.f32 %v3923_v16, %v3922_v15 }
 0x333   :  { %v4112_v23 = vadd.f32 %v3847_v28, %v4740_v57  ;;  %v3850_v52 = vadd.f32 %v3849_v18, %v3848_v40 }
 0x335   :  { %v4118_v25 = vadd.f32 %v3850_v52, %v4742_v60 }
 0x336   :  { %v3925_v55 = vpop.f32.mrb[64].mxu0 }
 0x337   :  { %v3851_v26 = vpop.f32.mrb[52].mxu1  ;;  %v3926_v30 = vpop.f32.mrb[65].mxu0 }
 0x338   :  { %v3852_v0 = vpop.f32.mrb[53].mxu1  ;;  %v3927_v31 = vadd.f32 %v3926_v30, %v3925_v55  ;;  %v3928_v32 = vpop.f32.mrb[66].mxu0 }
 0x339   :  { %v3853_v33 = vadd.f32 %v3852_v0, %v3851_v26  ;;  %v3854_v36 = vpop.f32.mrb[54].mxu1  ;;  %v3929_v37 = vpop.f32.mrb[67].mxu0 }
 0x33a   :  { %v3855_v39 = vpop.f32.mrb[55].mxu1  ;;  %v3930_v47 = vadd.f32 %v3929_v37, %v3928_v32  ;;  %v4794_v48 = vadd.f32 %v4112_v23, %v3927_v31 }
 0x33b   :  { %v4109_v42 = vadd.f32 %v3853_v33, %v4744_v63  ;;  %v3856_v11 = vadd.f32 %v3855_v39, %v3854_v36 }
 0x33c   :  { %v4797_v57 = vadd.f32 %v4118_v25, %v3930_v47 }
 0x33d   :  { %v4115_v60 = vadd.f32 %v3856_v11, %v4746_v3 }
 0x33e   :  { %v3931_v44 = vpop.f32.mrb[68].mxu0 }
 0x33f   :  { %v3857_v45 = vpop.f32.mrb[56].mxu1  ;;  %v3932_v51 = vpop.f32.mrb[69].mxu0 }
 0x340   :  { %v3858_v54 = vpop.f32.mrb[57].mxu1  ;;  %v3933_v49 = vadd.f32 %v3932_v51, %v3931_v44  ;;  %v3934_v56 = vpop.f32.mrb[70].mxu0 }
 0x341   :  { %v3859_v58 = vadd.f32 %v3858_v54, %v3857_v45  ;;  %v3860_v59 = vpop.f32.mrb[58].mxu1  ;;  %v3935_v62 = vpop.f32.mrb[71].mxu0 }
 0x342   :  { %v3861_v1 = vpop.f32.mrb[59].mxu1  ;;  %v3936_v2 = vadd.f32 %v3935_v62, %v3934_v56  ;;  %v4800_v4 = vadd.f32 %v4109_v42, %v3933_v49 }
 0x343   :  { %v4124_v63 = vadd.f32 %v3859_v58, %v4748_v6  ;;  %v3862_v5 = vadd.f32 %v3861_v1, %v3860_v59 }
 0x344   :  { %v4803_v8 = vadd.f32 %v4115_v60, %v3936_v2 }
 0x345   :  { %v4130_v3 = vadd.f32 %v3862_v5, %v4750_v9 }
 0x346   :  { %v3937_v10 = vpop.f32.mrb[72].mxu0 }
 0x347   :  { %v3863_v12 = vpop.f32.mrb[60].mxu1  ;;  %v3938_v13 = vpop.f32.mrb[73].mxu0 }
 0x348   :  { %v3864_v24 = vpop.f32.mrb[61].mxu1  ;;  %v3939_v15 = vadd.f32 %v3938_v13, %v3937_v10  ;;  %v3940_v28 = vpop.f32.mrb[74].mxu0 }
 0x349   :  { %v3865_v40 = vadd.f32 %v3864_v24, %v3863_v12  ;;  %v3866_v16 = vpop.f32.mrb[62].mxu1  ;;  %v3941_v18 = vpop.f32.mrb[75].mxu0 }
 0x34a   :  { %v3867_v23 = vpop.f32.mrb[63].mxu1  ;;  %v3942_v52 = vadd.f32 %v3941_v18, %v3940_v28  ;;  %v4806_v25 = vadd.f32 %v4124_v63, %v3939_v15 }
 0x34b   :  { %v4121_v6 = vadd.f32 %v3865_v40, %v4752_v14  ;;  %v3868_v55 = vadd.f32 %v3867_v23, %v3866_v16 }
 0x34c   :  { %v4809_v26 = vadd.f32 %v4130_v3, %v3942_v52 }
 0x34d   :  { %v4127_v9 = vadd.f32 %v3868_v55, %v4754_v29 }
 0x34e   :  { %v3943_v30 = vpop.f32.mrb[76].mxu0 }
 0x34f   :  { %v4015_v0 = vpop.f32.mrb[16].mxu1  ;;  %v3944_v31 = vpop.f32.mrb[77].mxu0 }
 0x350   :  { %v4078_v32 = vadd.f32 %v4764_v38, %v4015_v0  ;;  %v2492_v33 = vpop.f32.mrb[17].mxu1  ;;  %v3945_v36 = vadd.f32 %v3944_v31, %v3943_v30  ;;  %v3946_v37 = vpop.f32.mrb[78].mxu0 }
 0x351   :  { %v4082_v39 = vadd.f32 %v4756_v20, %v2492_v33  ;;  %v4016_v47 = vpop.f32.mrb[18].mxu1  ;;  %v3947_v42 = vpop.f32.mrb[79].mxu0 }
 0x352   :  { %v4086_v11 = vadd.f32 %v4766_v34, %v4016_v47  ;;  %v2495_v14 = vpop.f32.mrb[19].mxu1  ;;  %v3948_v60 = vadd.f32 %v3947_v42, %v3946_v37  ;;  %v4079_v44 = vadd.f32 %v4078_v32, %v4768_v41  ;;  %v4816_v45 = vadd.f32 %v4121_v6, %v3945_v36  ;;  %v4827_v34 = vld [vmem:[%s4960_s4] ss:$0 sm:$0xff]  ;;  %s4470_s4 = smov [#allocation11]  }
 0x353   :  { %v4090_v29 = vadd.f32 %v4758_v22, %v2495_v14  ;;  %v4083_v51 = vadd.f32 %v4082_v39, %v4760_v21  ;;  %s3371_s1 = sshll.u32 %s4470_s4, 4  ;;  %s3372_s1 = int_to_ptr.vmem [resolvable:$true] %s3371_s1 }
 0x354   :  { %v4087_v38 = vadd.f32 %v4086_v11, %v4770_v53  ;;  %v4821_v54 = vadd.f32 %v4127_v9, %v3948_v60  ;;  %s4432_s18 = scalar_lea.vmem %s3372_s1, 1024  ;;  %p4437_p5 = scmp.lt.s32.totalorder %s3372_s1, %s3372_s1 }
 0x355   :  { %v4091_v20 = vadd.f32 %v4090_v29, %v4762_v35  ;;  %p4433_p4 = scmp.ne.s32.totalorder %s3372_s1, %s4432_s18  ;;  %p4438_p6 = scmp.lt.s32.totalorder %s4432_s18, %s4432_s18 }
 0x356   :  { %v4047_v49 = vpop.f32.mrb[80].mxu0 }
 0x357   :  { %v4019_v56 = vpop.f32.mrb[20].mxu1  ;;  %v4080_v41 = vadd.f32 %v4079_v44, %v4047_v49  ;;  %v3072_v58 = vpop.f32.mrb[81].mxu0  ;;  %p4439_p7 = por %p4438_p6, %p4437_p5 }
 0x358   :  { %v4094_v59 = vadd.f32 %v4783_v19, %v4019_v56  ;;  %v2508_v22 = vpop.f32.mrb[21].mxu1  ;;  %v4084_v62 = vadd.f32 %v4083_v51, %v3072_v58  ;;  %v4048_v21 = vpop.f32.mrb[82].mxu0 }
 0x359   :  { %v3160_v53 = vadd.f32 %v4080_v41, %v4827_v34  ;;  %v4098_v1 = vadd.f32 %v4773_v43, %v2508_v22  ;;  %v4020_v2 = vpop.f32.mrb[22].mxu1  ;;  %v4088_v35 = vadd.f32 %v4087_v38, %v4048_v21  ;;  %v3075_v63 = vpop.f32.mrb[83].mxu0  ;;  %p4440_p8 = pnand %p4439_p7, %p4433_p4 }
 0x35a   :  { %v3158_v5 = vadd.f32 %v4084_v62, %v4827_v34  ;;  %v4102_v3 = vadd.f32 %v4786_v50, %v4020_v2  ;;  %v2511_v10 = vpop.f32.mrb[23].mxu1  ;;  %v4092_v12 = vadd.f32 %v4091_v20, %v3075_v63  ;;  %v4095_v13 = vadd.f32 %v4094_v59, %v4788_v27 }
 0x35b   :  { %v3161_v19 = vadd.f32 %v4088_v35, %v4827_v34  ;;  %v4106_v24 = vadd.f32 %v4776_v46, %v2511_v10  ;;  %v4099_v15 = vadd.f32 %v4098_v1, %v4778_v61  ;;  %vm3176_vm0 = vcmp.ge.f32.partialorder %v3160_v53, 0.0 }
 0x35c   :  { %v3159_v43 = vadd.f32 %v4092_v12, %v4827_v34  ;;  %v4103_v28 = vadd.f32 %v4102_v3, %v4790_v17  ;;  %v3192_v40 = vmul.f32 0.2, %v3160_v53  ;;  %vm3174_vm1 = vcmp.ge.f32.partialorder %v3158_v5, 0.0 }
 0x35d   :  { %v4107_v16 = vadd.f32 %v4106_v24, %v4780_v7  ;;  %v3190_v50 = vmul.f32 0.2, %v3158_v5  ;;  %v3193_v18 = vmul.f32 0.2, %v3161_v19  ;;  %vm3177_vm3 = vcmp.ge.f32.partialorder %v3161_v19, 0.0 }
 0x35e   :  { %v4051_v23 = vpop.f32.mrb[84].mxu0  ;;  %v4841_v52 = vsel %vm3176_vm0, %v3160_v53, %v3192_v40  ;;  %vm3175_vm2 = vcmp.ge.f32.partialorder %v3159_v43, 0.0  ;;  %v3191_v27 = vmul.f32 0.2, %v3159_v43 }
 0x35f   :  { %v4096_v46 = vadd.f32 %v4095_v13, %v4051_v23  ;;  %v3088_v6 = vpop.f32.mrb[85].mxu0  ;;  %v3224_v61 = vmul.f32 %v4841_v52, %v4841_v52  ;;  %v4845_v55 = vsel %vm3174_vm1, %v3158_v5, %v3190_v50  ;;  %v4854_v36 = vsel %vm3177_vm3, %v3161_v19, %v3193_v18 }
 0x360   :  { %v4100_v17 = vadd.f32 %v4099_v15, %v3088_v6  ;;  %v4052_v9 = vpop.f32.mrb[86].mxu0  ;;  %v3222_v7 = vmul.f32 %v4845_v55, %v4845_v55  ;;  %v4849_v30 = vsel %vm3175_vm2, %v3159_v43, %v3191_v27  ;;  %v3225_v14 = vmul.f32 %v4854_v36, %v4854_v36 }
 0x361   :  { %v3164_v0 = vadd.f32 %v4096_v46, %v4827_v34  ;;  %v4104_v31 = vadd.f32 %v4103_v28, %v4052_v9  ;;  %3242 = vadd.xlane.f32.xlu1 %v3224_v61  ;;  %v3091_v32 = vpop.f32.mrb[87].mxu0  ;;  %v3223_v33 = vmul.f32 %v4849_v30, %v4849_v30 }
 0x362   :  { %v3162_v37 = vadd.f32 %v4100_v17, %v4827_v34  ;;  %v4108_v39 = vadd.f32 %v4107_v16, %v3091_v32  ;;  %3238 = vadd.xlane.f32.xlu0 %v3222_v7 }
 0x363   :  { %v3165_v47 = vadd.f32 %v4104_v31, %v4827_v34  ;;  %vm3180_vm4 = vcmp.ge.f32.partialorder %v3164_v0, 0.0  ;;  %v3196_v42 = vmul.f32 0.2, %v3164_v0 }
 0x364   :  { %v3163_v11 = vadd.f32 %v4108_v39, %v4827_v34  ;;  %v3194_v60 = vmul.f32 0.2, %v3162_v37  ;;  %vm3178_vm6 = vcmp.ge.f32.partialorder %v3162_v37, 0.0 }
 0x365   :  { %3240 = vadd.xlane.f32.xlu1 %v3223_v33  ;;  %v4861_v44 = vsel %vm3180_vm4, %v3164_v0, %v3196_v42  ;;  %vm3181_vm5 = vcmp.ge.f32.partialorder %v3165_v47, 0.0  ;;  %v3197_v29 = vmul.f32 0.2, %v3165_v47 }
 0x366   :  { %3244 = vadd.xlane.f32.xlu0 %v3225_v14  ;;  %v3228_v51 = vmul.f32 %v4861_v44, %v4861_v44  ;;  %vm3179_vm7 = vcmp.ge.f32.partialorder %v3163_v11, 0.0  ;;  %v3195_v38 = vmul.f32 0.2, %v3163_v11  ;;  %v4869_v56 = vsel %vm3178_vm6, %v3162_v37, %v3194_v60 }
 0x367   :  { %v4865_v20 = vsel %vm3181_vm5, %v3165_v47, %v3197_v29  ;;  %v3226_v58 = vmul.f32 %v4869_v56, %v4869_v56 }
 0x368   :  { %v3229_v49 = vmul.f32 %v4865_v20, %v4865_v20  ;;  %v4871_v41 = vsel %vm3179_vm7, %v3163_v11, %v3195_v38 }
 0x369   :  { %3250 = vadd.xlane.f32.xlu1 %v3228_v51  ;;  %v3227_v59 = vmul.f32 %v4871_v41, %v4871_v41 }
 0x36a   :  { %3252 = vadd.xlane.f32.xlu0 %v3229_v49 }
 0x36d   :  { %3246 = vadd.xlane.f32.xlu1 %v3226_v58 }
 0x36e   :  { %3248 = vadd.xlane.f32.xlu0 %v3227_v59 }
 0x36f   :  { %v4055_v22 = vpop.f32.mrb[24].mxu1 }
 0x370   :  { %v4111_v62 = vadd.f32 %v4800_v4, %v4055_v22  ;;  %v3104_v21 = vpop.f32.mrb[25].mxu1 }
 0x371   :  { %v4114_v53 = vadd.f32 %v4794_v48, %v3104_v21  ;;  %v4056_v1 = vpop.f32.mrb[26].mxu1 }
 0x372   :  { %v3168_v2 = vadd.f32 %v4111_v62, %v4827_v34  ;;  %v4117_v35 = vadd.f32 %v4803_v8, %v4056_v1  ;;  %v3107_v63 = vpop.f32.mrb[27].mxu1 }
 0x373   :  { %v3166_v5 = vadd.f32 %v4114_v53, %v4827_v34  ;;  %v4120_v3 = vadd.f32 %v4797_v57, %v3107_v63 }
 0x374   :  { %v3169_v10 = vadd.f32 %v4117_v35, %v4827_v34  ;;  %vm3184_vm8 = vcmp.ge.f32.partialorder %v3168_v2, 0.0  ;;  %v3200_v12 = vmul.f32 0.2, %v3168_v2 }
 0x375   :  { %v3167_v13 = vadd.f32 %v4120_v3, %v4827_v34  ;;  %vm3182_vm9 = vcmp.ge.f32.partialorder %v3166_v5, 0.0  ;;  %v3198_v4 = vmul.f32 0.2, %v3166_v5 }
 0x376   :  { %v4885_v19 = vsel %vm3184_vm8, %v3168_v2, %v3200_v12  ;;  %vm3185_vm10 = vcmp.ge.f32.partialorder %v3169_v10, 0.0  ;;  %v3201_v48 = vmul.f32 0.2, %v3169_v10 }
 0x377   :  { %v4059_v24 = vpop.f32.mrb[28].mxu1  ;;  %v3232_v8 = vmul.f32 %v4885_v19, %v4885_v19  ;;  %vm3183_vm11 = vcmp.ge.f32.partialorder %v3167_v13, 0.0  ;;  %v3199_v15 = vmul.f32 0.2, %v3167_v13  ;;  %v4892_v40 = vsel %vm3182_vm9, %v3166_v5, %v3198_v4 }
 0x378   :  { %v4123_v57 = vadd.f32 %v4816_v45, %v4059_v24  ;;  %v3120_v43 = vpop.f32.mrb[29].mxu1  ;;  %v4890_v28 = vsel %vm3185_vm10, %v3169_v10, %v3201_v48 }
 0x379   :  { %v4126_v16 = vadd.f32 %v4806_v25, %v3120_v43  ;;  %v4060_v50 = vpop.f32.mrb[30].mxu1  ;;  %3258 = vadd.xlane.f32.xlu1 %v3232_v8  ;;  %v3233_v18 = vmul.f32 %v4890_v28, %v4890_v28  ;;  %v4897_v23 = vsel %vm3183_vm11, %v3167_v13, %v3199_v15  ;;  %v3230_v25 = vmul.f32 %v4892_v40, %v4892_v40 }
 0x37a   :  { %v3172_v27 = vadd.f32 %v4123_v57, %v4827_v34  ;;  %v4129_v46 = vadd.f32 %v4821_v54, %v4060_v50  ;;  %v3123_v6 = vpop.f32.mrb[31].mxu1  ;;  %v3231_v9 = vmul.f32 %v4897_v23, %v4897_v23 }
 0x37b   :  { %v3170_v45 = vadd.f32 %v4126_v16, %v4827_v34  ;;  %v4132_v61 = vadd.f32 %v4809_v26, %v3123_v6  ;;  %3260 = vadd.xlane.f32.xlu0 %v3233_v18 }
 0x37c   :  { %v3173_v17 = vadd.f32 %v4129_v46, %v4827_v34  ;;  %v3204_v54 = vmul.f32 0.2, %v3172_v27  ;;  %vm3188_vm13 = vcmp.ge.f32.partialorder %v3172_v27, 0.0 }
 0x37d   :  { %v3171_v7 = vadd.f32 %v4132_v61, %v4827_v34  ;;  %3254 = vadd.xlane.f32.xlu1 %v3230_v25  ;;  %vm3186_vm12 = vcmp.ge.f32.partialorder %v3170_v45, 0.0  ;;  %v3202_v0 = vmul.f32 0.2, %v3170_v45 }
 0x37e   :  { %v3205_v32 = vmul.f32 0.2, %v3173_v17  ;;  %vm3189_vm15 = vcmp.ge.f32.partialorder %v3173_v17, 0.0  ;;  %v4915_v39 = vsel %vm3188_vm13, %v3172_v27, %v3204_v54 }
 0x37f   :  { %3256 = vadd.xlane.f32.xlu0 %v3231_v9  ;;  %v4909_v31 = vsel %vm3186_vm12, %v3170_v45, %v3202_v0  ;;  %vm3187_vm14 = vcmp.ge.f32.partialorder %v3171_v7, 0.0  ;;  %v3203_v26 = vmul.f32 0.2, %v3171_v7  ;;  %v3236_v42 = vmul.f32 %v4915_v39, %v4915_v39 }
 0x380   :  { %v3234_v33 = vmul.f32 %v4909_v31, %v4909_v31  ;;  %v4919_v47 = vsel %vm3189_vm15, %v3173_v17, %v3205_v32 }
 0x381   :  { %v4913_v37 = vsel %vm3187_vm14, %v3171_v7, %v3203_v26  ;;  %v3237_v11 = vmul.f32 %v4919_v47, %v4919_v47 }
 0x382   :  { %3262 = vadd.xlane.f32.xlu1 %v3234_v33  ;;  %v3235_v34 = vmul.f32 %v4913_v37, %v4913_v37 }
 0x384   :  { %3264 = vadd.xlane.f32.xlu0 %v3235_v34 }
 0x386   :  { %3266 = vadd.xlane.f32.xlu1 %v3236_v42 }
 0x388   :  { %3268 = vadd.xlane.f32.xlu0 %v3237_v11 }
 0x3ee   :  { %v3243_v14 = vpop.xlane.xlu1 %3242 }
 0x3ef   :  { %v3272_v60 = vmul.f32 0.0078125, %v3243_v14  ;;  %v3239_v29 = vpop.xlane.xlu0 %3238 }
 0x3f0   :  { %v3270_v51 = vmul.f32 0.0078125, %v3239_v29 }
 0x3f1   :  { %v3288_v38 = vadd.f32 1e-08, %v3272_v60 }
 0x3f2   :  { %v3286_v49 = vadd.f32 1e-08, %v3270_v51  ;;  %v3241_v58 = vpop.xlane.xlu1 %3240 }
 0x3f3   :  { %v3271_v59 = vmul.f32 0.0078125, %v3241_v58  ;;  %v3245_v22 = vpop.xlane.xlu0 %3244 }
 0x3f4   :  { %v3273_v62 = vmul.f32 0.0078125, %v3245_v22  ;;  %4312 = vrsqrt.f32 %v3286_v49 }
 0x3f5   :  { %v3287_v21 = vadd.f32 1e-08, %v3271_v59  ;;  %4314 = vrsqrt.f32 %v3288_v38 }
 0x3f6   :  { %v3289_v53 = vadd.f32 1e-08, %v3273_v62  ;;  %v3251_v1 = vpop.xlane.xlu1 %3250 }
 0x3f7   :  { %4316 = vrsqrt.f32 %v3287_v21  ;;  %v3276_v2 = vmul.f32 0.0078125, %v3251_v1  ;;  %v3253_v35 = vpop.xlane.xlu0 %3252 }
 0x3f8   :  { %4318 = vrsqrt.f32 %v3289_v53  ;;  %v3277_v63 = vmul.f32 0.0078125, %v3253_v35 }
 0x3f9   :  { %v3292_v5 = vadd.f32 1e-08, %v3276_v2 }
 0x3fa   :  { %v3293_v3 = vadd.f32 1e-08, %v3277_v63  ;;  %v3247_v10 = vpop.xlane.xlu1 %3246 }
 0x3fb   :  { %4320 = vrsqrt.f32 %v3292_v5  ;;  %v3274_v12 = vmul.f32 0.0078125, %v3247_v10  ;;  %v3249_v13 = vpop.xlane.xlu0 %3248 }
 0x3fc   :  { %4322 = vrsqrt.f32 %v3293_v3  ;;  %v3275_v4 = vmul.f32 0.0078125, %v3249_v13 }
 0x3fd   :  { %v3290_v48 = vadd.f32 1e-08, %v3274_v12 }
 0x3fe   :  { %v3291_v24 = vadd.f32 1e-08, %v3275_v4  ;;  %v4313_v8 = vpop.eup %4312 }
 0x3ff   :  { %4324 = vrsqrt.f32 %v3290_v48  ;;  %v4315_v15 = vpop.eup %4314  ;;  %v3318_v16 = vmul.f32 %v4313_v8, %v4845_v55 }
 0x400   :  { %4326 = vrsqrt.f32 %v3291_v24  ;;  %v3320_v18 = vmul.f32 %v4315_v15, %v4841_v52 }
 0x401   :  { %v4317_v57 = vpop.eup %4316 }
 0x402   :  { %v4319_v43 = vpop.eup %4318  ;;  %v3319_v50 = vmul.f32 %v4317_v57, %v4849_v30 }
 0x403   :  { %v3321_v27 = vmul.f32 %v4319_v43, %v4854_v36 }
 0x404   :  { %v3681_v46 = vpack.c.bf16 %v3319_v50, %v3318_v16 }
 0x405   :  { %v4321_v6 = vpop.eup %4320  ;;  %v3686_v45 = vpack.c.bf16 %v3321_v27, %v3320_v18 }
 0x406   :  { %v4323_v61 = vpop.eup %4322  ;;  %3682 = vst [vmem:[#allocation11] sm:$0xff] %v3681_v46   ;;  %v3259_v25 = vpop.xlane.xlu1 %3258  ;;  %v3324_v17 = vmul.f32 %v4321_v6, %v4861_v44 }
 0x407   :  { %3718 = vst [vmem:[#allocation11 + $0x8] sm:$0xff] %v3686_v45   ;;  %v3325_v9 = vmul.f32 %v4323_v61, %v4865_v20  ;;  %v3280_v7 = vmul.f32 0.0078125, %v3259_v25 }
 0x408   :  { %v3261_v0 = vpop.xlane.xlu0 %3260 }
 0x409   :  { %v4325_v55 = vpop.eup %4324  ;;  %v3696_v54 = vpack.c.bf16 %v3325_v9, %v3324_v17  ;;  %v3296_v30 = vadd.f32 1e-08, %v3280_v7  ;;  %v3281_v26 = vmul.f32 0.0078125, %v3261_v0 }
 0x40a   :  { %v4327_v52 = vpop.eup %4326  ;;  %v3322_v36 = vmul.f32 %v4325_v55, %v4869_v56  ;;  %v3255_v32 = vpop.xlane.xlu1 %3254 }
 0x40b   :  { %3720 = vst [vmem:[#allocation11 + $0x18] sm:$0xff] %v3696_v54   ;;  %v3323_v33 = vmul.f32 %v4327_v52, %v4871_v41  ;;  %4328 = vrsqrt.f32 %v3296_v30  ;;  %v3297_v34 = vadd.f32 1e-08, %v3281_v26  ;;  %v3278_v42 = vmul.f32 0.0078125, %v3255_v32 }
 0x40c   :  { %v3257_v11 = vpop.xlane.xlu0 %3256 }
 0x40d   :  { %v3691_v44 = vpack.c.bf16 %v3323_v33, %v3322_v36  ;;  %4330 = vrsqrt.f32 %v3297_v34  ;;  %v3294_v20 = vadd.f32 1e-08, %v3278_v42  ;;  %v3279_v14 = vmul.f32 0.0078125, %v3257_v11 }
 0x40f   :  { %3719 = vst [vmem:[#allocation11 + $0x10] sm:$0xff] %v3691_v44   ;;  %4332 = vrsqrt.f32 %v3294_v20  ;;  %v3295_v60 = vadd.f32 1e-08, %v3279_v14  ;;  %v3263_v29 = vpop.xlane.xlu1 %3262 }
 0x410   :  { %v3282_v51 = vmul.f32 0.0078125, %v3263_v29 }
 0x411   :  { %4334 = vrsqrt.f32 %v3295_v60  ;;  %v3265_v38 = vpop.xlane.xlu0 %3264 }
 0x412   :  { %v3298_v56 = vadd.f32 1e-08, %v3282_v51  ;;  %v3283_v49 = vmul.f32 0.0078125, %v3265_v38 }
 0x413   :  { %v3267_v58 = vpop.xlane.xlu1 %3266 }
 0x414   :  { %4336 = vrsqrt.f32 %v3298_v56  ;;  %v3299_v41 = vadd.f32 1e-08, %v3283_v49  ;;  %v3284_v59 = vmul.f32 0.0078125, %v3267_v58 }
 0x415   :  { %v4329_v22 = vpop.eup %4328  ;;  %v3269_v62 = vpop.xlane.xlu0 %3268 }
 0x416   :  { %4338 = vrsqrt.f32 %v3299_v41  ;;  %v3300_v21 = vadd.f32 1e-08, %v3284_v59  ;;  %v3285_v53 = vmul.f32 0.0078125, %v3269_v62  ;;  %v3328_v2 = vmul.f32 %v4329_v22, %v4885_v19 }
 0x417   :  { %v4331_v1 = vpop.eup %4330 }
 0x418   :  { %v3329_v35 = vmul.f32 %v4331_v1, %v4890_v28  ;;  %4340 = vrsqrt.f32 %v3300_v21  ;;  %v3301_v63 = vadd.f32 1e-08, %v3285_v53 }
 0x419   :  { %v4333_v5 = vpop.eup %4332 }
 0x41a   :  { %v3706_v3 = vpack.c.bf16 %v3329_v35, %v3328_v2  ;;  %4342 = vrsqrt.f32 %v3301_v63  ;;  %v3326_v12 = vmul.f32 %v4333_v5, %v4892_v40 }
 0x41b   :  { %v4335_v10 = vpop.eup %4334 }
 0x41c   :  { %3722 = vst [vmem:[#allocation11 + $0x28] sm:$0xff] %v3706_v3   ;;  %v3327_v13 = vmul.f32 %v4335_v10, %v4897_v23 }
 0x41e   :  { %v4337_v4 = vpop.eup %4336  ;;  %v3701_v48 = vpack.c.bf16 %v3327_v13, %v3326_v12 }
 0x41f   :  { %v3330_v8 = vmul.f32 %v4337_v4, %v4909_v31 }
 0x420   :  { %v4339_v24 = vpop.eup %4338  ;;  %3721 = vst [vmem:[#allocation11 + $0x20] sm:$0xff] %v3701_v48  }
 0x421   :  { %v3331_v19 = vmul.f32 %v4339_v24, %v4913_v37 }
 0x422   :  { %v4341_v28 = vpop.eup %4340 }
 0x423   :  { %v3711_v15 = vpack.c.bf16 %v3331_v19, %v3330_v8  ;;  %v3332_v43 = vmul.f32 %v4341_v28, %v4915_v39 }
 0x424   :  { %v4343_v57 = vpop.eup %4342 }
 0x425   :  { %3723 = vst [vmem:[#allocation11 + $0x30] sm:$0xff] %v3711_v15   ;;  %v3333_v40 = vmul.f32 %v4343_v57, %v4919_v47 }
 0x427   :  { %v3716_v16 = vpack.c.bf16 %v3333_v40, %v3332_v43 }
 0x429   :  { %3724 = vst [vmem:[#allocation11 + $0x38] sm:$0xff] %v3716_v16  }
 0x42a   :  { %4443 = shalt.err (!%p4440_p8)
}
 0x42b   :  { %s4444_s21 = scalar_lea.hbm %s4961_s5, 1024 }
 0x42c   :  { %p4445_p9 = scmp.ne.s32.totalorder %s4961_s5, %s4444_s21  ;;  %p4448_p10 = scmp.lt.u32.totalorder %s4444_s21, %s4961_s5 }
 0x42e   :  { %p4450_p11 = pnand %p4448_p10, %p4445_p9 }
 0x430   :  { %4453 = shalt.err (!%p4450_p11)
}
 0x431   :  { %3377 = dma.vmem_to_hbm [thread:$0]  %s3372_s1, 1024, %s4961_s5, [#allocation5], %s4464_s29, %s4464_s29, %s4468_s2  }
 0x432   :  { %4460 = dma.done.wait [#allocation5], 1024  }
 0x433   :  { %4461 = vsyncadd [#allocation5], 4294966272 }
 0x434   :  { %3381 = vsyncpa [#allocation4], 1 }
 0x435   :  { %3382 = vsyncpa [#allocation7], 1 }
 0x436   :  { %3383 = vsyncpa [#allocation10], 1 }
 0x437   :  { %3384 = vsyncpa [#allocation5], 1 }

</bundles_post_ra>
